<compile_context>
chip_gen: v5e
topology: v5e:2x2
jax: 0.10.0
libtpu: 0.0.40
codegen_flags: <defaults>
</compile_context>

<pallas_src>
import functools
import math

import jax
import jax.numpy as jnp
import numpy as np
from jax.experimental import pallas as pl
from jax.experimental.pallas import tpu as pltpu

# ---------------------------------------------------------------------------
# Model configuration (original values in comments).
# ---------------------------------------------------------------------------
LEN_OF_SEGMENTS = 32                  # original: 400
LEN_OF_INPUT = 4 * LEN_OF_SEGMENTS    # original: 1600
LEN_OF_OUTPUT = 5 * LEN_OF_SEGMENTS   # original: 2000
HIDDEN = 256                          # original: 2048
BATCH = 4

PAD_UNIT = 256   # pad K/N once to multiples of 256 (MXU-friendly on v6e/v7x)
TK_CAP = 512     # K-tile cap (multiple of 256 per v6e/v7x MXU cadence)
TN_CAP = 1024    # N-tile cap: keeps bf16 weight tiles <=1 MiB (v7x 64 MiB VMEM
                 # safe) and >=2 N-programs at the original N=2048 (2 TCs)


def _round_up(v, m):
    return ((v + m - 1) // m) * m


def _pick_tile(dim_padded, cap):
    """Largest multiple-of-PAD_UNIT tile <= cap that divides dim_padded."""
    t = min(dim_padded, cap)
    while dim_padded % t:
        t -= PAD_UNIT
    return t


# ---------------------------------------------------------------------------
# Kernel 1: fully fused MLP (all weights VMEM-resident, one pallas_call).
# Used when the padded bf16 weight stack fits comfortably in VMEM (always true
# at the demo sizes; true at original sizes on v6e in bf16 per review).
# ---------------------------------------------------------------------------
def _fused_mlp_kernel(x_ref, w_ref, b_ref, o_ref, *, n_layers):
    h = x_ref[...]                                      # (Bp, Hp) f32
    for i in range(n_layers):                           # static unroll (7)
        z = jnp.dot(h.astype(jnp.bfloat16), w_ref[i],   # bf16 x bf16 -> f32 acc
                    preferred_element_type=jnp.float32) + b_ref[i]
        h = jnp.maximum(z, 0.0) if i < n_layers - 1 else z
    o_ref[...] = h


def fused_mlp(x2d, w_stack, b_stack, *, out_dim):
    """x2d: (B, L) f32; w_stack: (nl, Hp, Hp) bf16; b_stack: (nl, 1, Hp) f32."""
    B, L = x2d.shape
    n_layers, Hp, _ = w_stack.shape
    Bp = _round_up(max(B, 8), 8)
    xp = jnp.pad(x2d, ((0, Bp - B), (0, Hp - L)))       # tiny; fused under jit

    out = pl.pallas_call(
        functools.partial(_fused_mlp_kernel, n_layers=n_layers),
        out_shape=jax.ShapeDtypeStruct((Bp, Hp), jnp.float32),
        grid_spec=pltpu.PrefetchScalarGridSpec(
            num_scalar_prefetch=0,
            grid=(1,),
            in_specs=[
                pl.BlockSpec((Bp, Hp), lambda i: (0, 0)),
                pl.BlockSpec((n_layers, Hp, Hp), lambda i: (0, 0, 0)),
                pl.BlockSpec((n_layers, 1, Hp), lambda i: (0, 0, 0)),
            ],
            out_specs=pl.BlockSpec((Bp, Hp), lambda i: (0, 0)),
        ),
    )(xp, w_stack, b_stack)
    return out[:B, :out_dim]


# ---------------------------------------------------------------------------
# Kernel 2: tiled linear (scalable path).  Accumulates directly into the
# resident output block across the K grid axis (no acc scratch).
# ---------------------------------------------------------------------------
def _linear_kernel(x_ref, w_ref, b_ref, o_ref, *, apply_relu: bool):
    k = pl.program_id(2)

    @pl.when(k == 0)
    def _():
        o_ref[...] = jnp.zeros_like(o_ref)

    o_ref[...] += jnp.dot(
        x_ref[...].astype(jnp.bfloat16), w_ref[...],
        preferred_element_type=jnp.float32,
    )

    @pl.when(k == pl.num_programs(2) - 1)
    def _():
        out = o_ref[...] + b_ref[...]            # bias broadcast over rows
        if apply_relu:
            out = jnp.maximum(out, 0.0)
        o_ref[...] = out


def pallas_linear_padded(xp, wp, bp, *, apply_relu):
    """relu?(xp @ wp + bp) on already-padded operands.

    xp: (Bp, Kp) f32, wp: (Kp, Np) bf16, bp: (1, Np) f32  ->  (Bp, Np) f32.
    Padding/casting of weights is done once at init, NOT here.
    """
    Bp, Kp = xp.shape
    Kw, Np = wp.shape
    assert Kp == Kw and bp.shape == (1, Np)

    tm = Bp                              # small batch fits one sublane tile
    tk = _pick_tile(Kp, TK_CAP)
    tn = _pick_tile(Np, TN_CAP)
    grid = (Bp // tm, Np // tn, Kp // tk)

    return pl.pallas_call(
        functools.partial(_linear_kernel, apply_relu=apply_relu),
        out_shape=jax.ShapeDtypeStruct((Bp, Np), jnp.float32),
        grid_spec=pltpu.PrefetchScalarGridSpec(
            num_scalar_prefetch=0,
            grid=grid,
            in_specs=[
                pl.BlockSpec((tm, tk), lambda i, j, k: (i, k)),   # activations
                pl.BlockSpec((tk, tn), lambda i, j, k: (k, j)),   # bf16 weights
                pl.BlockSpec((1, tn), lambda i, j, k: (0, j)),    # bias
            ],
            out_specs=pl.BlockSpec((tm, tn), lambda i, j, k: (i, j)),
        ),
        compiler_params=pltpu.CompilerParams(
            dimension_semantics=("parallel", "parallel", "arbitrary"),
        ),
    )(xp, wp, bp)


# ---------------------------------------------------------------------------
# Deterministic parameter init (mirrors nn.Linear + kaiming_uniform_ for relu).
# ---------------------------------------------------------------------------
def init_linear(key, fan_in, fan_out):
    kw, kb = jax.random.split(key)
    w_bound = math.sqrt(2.0) * math.sqrt(3.0 / fan_in)      # kaiming_uniform
    w = jax.random.uniform(kw, (fan_in, fan_out), jnp.float32,
                           minval=-w_bound, maxval=w_bound)
    b_bound = 1.0 / math.sqrt(fan_in)                        # torch bias default
    b = jax.random.uniform(kb, (fan_out,), jnp.float32,
                           minval=-b_bound, maxval=b_bound)
    return w, b


def init_net_fc(key):
    dims = [LEN_OF_INPUT] + [HIDDEN] * 6 + [LEN_OF_OUTPUT]
    keys = jax.random.split(key, len(dims) - 1)
    return [init_linear(k, fi, fo) for k, fi, fo in zip(keys, dims[:-1], dims[1:])]


# ---------------------------------------------------------------------------
# One-time parameter preparation: pad to tile-friendly shapes + cast to bf16.
# ---------------------------------------------------------------------------
def prepare_params_tiled(params):
    prepared = []
    for w, b in params:
        K, N = w.shape
        Kp, Np = _round_up(K, PAD_UNIT), _round_up(N, PAD_UNIT)
        wp = jnp.pad(w, ((0, Kp - K), (0, Np - N))).astype(jnp.bfloat16)
        bp = jnp.pad(b, (0, Np - N)).reshape(1, Np)          # bias stays f32
        prepared.append((wp, bp))
    return prepared


def prepare_params_fused(params):
    dims = [params[0][0].shape[0]] + [w.shape[1] for w, _ in params]
    Hp = _round_up(max(dims), PAD_UNIT)
    ws, bs = [], []
    for w, b in params:
        K, N = w.shape
        ws.append(jnp.pad(w, ((0, Hp - K), (0, Hp - N))).astype(jnp.bfloat16))
        bs.append(jnp.pad(b, (0, Hp - N)).reshape(1, Hp))
    return jnp.stack(ws), jnp.stack(bs)


# ---------------------------------------------------------------------------
# Forward passes (jitted end to end; activations stay padded between layers).
# ---------------------------------------------------------------------------
def net_fc_forward_fused(w_stack, b_stack, x):
    x2d = x.reshape(-1, LEN_OF_INPUT)                  # x.view(-1, to_linear)
    return fused_mlp(x2d, w_stack, b_stack, out_dim=LEN_OF_OUTPUT)


def net_fc_forward_tiled(params_padded, x):
    x2d = x.reshape(-1, LEN_OF_INPUT)
    B = x2d.shape[0]
    Bp = _round_up(max(B, 8), 8)
    Kp0 = params_padded[0][0].shape[0]
    h = jnp.pad(x2d, ((0, Bp - B), (0, Kp0 - LEN_OF_INPUT)))   # pad once
    n = len(params_padded)
    for i, (wp, bp) in enumerate(params_padded):
        h = pallas_linear_padded(h, wp, bp, apply_relu=(i != n - 1))
    return h[:B, :LEN_OF_OUTPUT]                               # slice once


# Reference with the same declared numerics as the kernels (bf16 weights and
# activations on the MXU, f32 accumulation, f32 bias/ReLU).
def net_fc_reference(params, x):
    h = x.reshape(-1, LEN_OF_INPUT)
    n = len(params)
    for i, (w, b) in enumerate(params):
        z = jnp.dot(h.astype(jnp.bfloat16), w.astype(jnp.bfloat16),
                    preferred_element_type=jnp.float32) + b
        h = jnp.maximum(z, 0.0) if i != n - 1 else z
    return h


if __name__ == "__main__":
    key = jax.random.PRNGKey(0)
    k_params, k_x = jax.random.split(key)

    params = init_net_fc(k_params)
    x = jax.random.normal(k_x, (BATCH, 1, LEN_OF_INPUT), dtype=jnp.float32)

    # Pad + cast weights once, outside the jitted hot path.
    w_stack, b_stack = prepare_params_fused(params)
    params_tiled = prepare_params_tiled(params)

    fused_fwd = jax.jit(net_fc_forward_fused)
    tiled_fwd = jax.jit(net_fc_forward_tiled)

    out_fused = jax.block_until_ready(fused_fwd(w_stack, b_stack, x))
    out_tiled = jax.block_until_ready(tiled_fwd(params_tiled, x))
    ref = jax.block_until_ready(net_fc_reference(params, x))

    assert out_fused.shape == (BATCH, LEN_OF_OUTPUT)
    assert out_tiled.shape == (BATCH, LEN_OF_OUTPUT)
    # Kernels and reference share bf16-weight / f32-accumulate semantics; small
    # slack covers MXU pass-ordering / accumulation-order differences.
    np.testing.assert_allclose(np.asarray(out_fused), np.asarray(ref),
                               rtol=5e-3, atol=5e-3)
    np.testing.assert_allclose(np.asarray(out_tiled), np.asarray(ref),
                               rtol=5e-3, atol=5e-3)

    print("KERNEL_OK")
</pallas_src>

<mosaic_0001>
module attributes {stable_mosaic.version = 11 : i64} {
  func.func @_fused_mlp_kernel(%arg0: i32, %arg1: memref<8x256xf32, #tpu.memory_space<vmem>>, %arg2: memref<7x256x256xbf16, #tpu.memory_space<vmem>>, %arg3: memref<7x1x256xf32, #tpu.memory_space<vmem>>, %arg4: memref<8x256xf32, #tpu.memory_space<vmem>>) attributes {dimension_semantics = [#tpu.dimension_semantics<arbitrary>], iteration_bounds = array<i64: 1>, scalar_prefetch = 0 : i64, scratch_operands = 0 : i64, tpu.core_type = #tpu.core_type<tc>, window_params = [{pipeline_mode = #tpu.pipeline_mode<synchronous>, transform_indices = @transform_0, window_bounds = array<i64: 8, 256>}, {pipeline_mode = #tpu.pipeline_mode<synchronous>, transform_indices = @transform_1, window_bounds = array<i64: 7, 256, 256>}, {pipeline_mode = #tpu.pipeline_mode<synchronous>, transform_indices = @transform_2, window_bounds = array<i64: 7, 1, 256>}, {pipeline_mode = #tpu.pipeline_mode<synchronous>, transform_indices = @transform_3, window_bounds = array<i64: 8, 256>}]} {
    %c0 = arith.constant 0 : index
    %c0_0 = arith.constant 0 : index
    %0 = vector.load %arg1[%c0, %c0_0] : memref<8x256xf32, #tpu.memory_space<vmem>>, vector<8x256xf32>
    %1 = arith.truncf %0 : vector<8x256xf32> to vector<8x256xbf16>
    %c0_1 = arith.constant 0 : index
    %c0_2 = arith.constant 0 : index
    %c0_3 = arith.constant 0 : index
    %2 = vector.load %arg2[%c0_1, %c0_2, %c0_3] : memref<7x256x256xbf16, #tpu.memory_space<vmem>>, vector<1x256x256xbf16>
    %3 = vector.shape_cast %2 : vector<1x256x256xbf16> to vector<256x256xbf16>
    %cst = arith.constant dense<0.000000e+00> : vector<8x256xf32>
    %4 = tpu.matmul %1, %3, %cst {dimension_numbers = #tpu.dot_dimension_numbers<[1], [0], [0], [1], [0, 0, 1, 1], [], []>} : vector<8x256xbf16>, vector<256x256xbf16>, vector<8x256xf32> -> vector<8x256xf32>
    %c0_4 = arith.constant 0 : index
    %c0_5 = arith.constant 0 : index
    %c0_6 = arith.constant 0 : index
    %5 = vector.load %arg3[%c0_4, %c0_5, %c0_6] : memref<7x1x256xf32, #tpu.memory_space<vmem>>, vector<1x1x256xf32>
    %6 = vector.shape_cast %5 : vector<1x1x256xf32> to vector<1x256xf32>
    %7 = vector.broadcast %6 : vector<1x256xf32> to vector<8x256xf32>
    %8 = arith.addf %4, %7 : vector<8x256xf32>
    %cst_7 = arith.constant 0.000000e+00 : f32
    %9 = vector.broadcast %cst_7 : f32 to vector<8x256xf32>
    %10 = arith.maximumf %8, %9 : vector<8x256xf32>
    %11 = arith.truncf %10 : vector<8x256xf32> to vector<8x256xbf16>
    %c1 = arith.constant 1 : index
    %c0_8 = arith.constant 0 : index
    %c0_9 = arith.constant 0 : index
    %12 = vector.load %arg2[%c1, %c0_8, %c0_9] : memref<7x256x256xbf16, #tpu.memory_space<vmem>>, vector<1x256x256xbf16>
    %13 = vector.shape_cast %12 : vector<1x256x256xbf16> to vector<256x256xbf16>
    %cst_10 = arith.constant dense<0.000000e+00> : vector<8x256xf32>
    %14 = tpu.matmul %11, %13, %cst_10 {dimension_numbers = #tpu.dot_dimension_numbers<[1], [0], [0], [1], [0, 0, 1, 1], [], []>} : vector<8x256xbf16>, vector<256x256xbf16>, vector<8x256xf32> -> vector<8x256xf32>
    %c1_11 = arith.constant 1 : index
    %c0_12 = arith.constant 0 : index
    %c0_13 = arith.constant 0 : index
    %15 = vector.load %arg3[%c1_11, %c0_12, %c0_13] : memref<7x1x256xf32, #tpu.memory_space<vmem>>, vector<1x1x256xf32>
    %16 = vector.shape_cast %15 : vector<1x1x256xf32> to vector<1x256xf32>
    %17 = vector.broadcast %16 : vector<1x256xf32> to vector<8x256xf32>
    %18 = arith.addf %14, %17 : vector<8x256xf32>
    %cst_14 = arith.constant 0.000000e+00 : f32
    %19 = vector.broadcast %cst_14 : f32 to vector<8x256xf32>
    %20 = arith.maximumf %18, %19 : vector<8x256xf32>
    %21 = arith.truncf %20 : vector<8x256xf32> to vector<8x256xbf16>
    %c2 = arith.constant 2 : index
    %c0_15 = arith.constant 0 : index
    %c0_16 = arith.constant 0 : index
    %22 = vector.load %arg2[%c2, %c0_15, %c0_16] : memref<7x256x256xbf16, #tpu.memory_space<vmem>>, vector<1x256x256xbf16>
    %23 = vector.shape_cast %22 : vector<1x256x256xbf16> to vector<256x256xbf16>
    %cst_17 = arith.constant dense<0.000000e+00> : vector<8x256xf32>
    %24 = tpu.matmul %21, %23, %cst_17 {dimension_numbers = #tpu.dot_dimension_numbers<[1], [0], [0], [1], [0, 0, 1, 1], [], []>} : vector<8x256xbf16>, vector<256x256xbf16>, vector<8x256xf32> -> vector<8x256xf32>
    %c2_18 = arith.constant 2 : index
    %c0_19 = arith.constant 0 : index
    %c0_20 = arith.constant 0 : index
    %25 = vector.load %arg3[%c2_18, %c0_19, %c0_20] : memref<7x1x256xf32, #tpu.memory_space<vmem>>, vector<1x1x256xf32>
    %26 = vector.shape_cast %25 : vector<1x1x256xf32> to vector<1x256xf32>
    %27 = vector.broadcast %26 : vector<1x256xf32> to vector<8x256xf32>
    %28 = arith.addf %24, %27 : vector<8x256xf32>
    %cst_21 = arith.constant 0.000000e+00 : f32
    %29 = vector.broadcast %cst_21 : f32 to vector<8x256xf32>
    %30 = arith.maximumf %28, %29 : vector<8x256xf32>
    %31 = arith.truncf %30 : vector<8x256xf32> to vector<8x256xbf16>
    %c3 = arith.constant 3 : index
    %c0_22 = arith.constant 0 : index
    %c0_23 = arith.constant 0 : index
    %32 = vector.load %arg2[%c3, %c0_22, %c0_23] : memref<7x256x256xbf16, #tpu.memory_space<vmem>>, vector<1x256x256xbf16>
    %33 = vector.shape_cast %32 : vector<1x256x256xbf16> to vector<256x256xbf16>
    %cst_24 = arith.constant dense<0.000000e+00> : vector<8x256xf32>
    %34 = tpu.matmul %31, %33, %cst_24 {dimension_numbers = #tpu.dot_dimension_numbers<[1], [0], [0], [1], [0, 0, 1, 1], [], []>} : vector<8x256xbf16>, vector<256x256xbf16>, vector<8x256xf32> -> vector<8x256xf32>
    %c3_25 = arith.constant 3 : index
    %c0_26 = arith.constant 0 : index
    %c0_27 = arith.constant 0 : index
    %35 = vector.load %arg3[%c3_25, %c0_26, %c0_27] : memref<7x1x256xf32, #tpu.memory_space<vmem>>, vector<1x1x256xf32>
    %36 = vector.shape_cast %35 : vector<1x1x256xf32> to vector<1x256xf32>
    %37 = vector.broadcast %36 : vector<1x256xf32> to vector<8x256xf32>
    %38 = arith.addf %34, %37 : vector<8x256xf32>
    %cst_28 = arith.constant 0.000000e+00 : f32
    %39 = vector.broadcast %cst_28 : f32 to vector<8x256xf32>
    %40 = arith.maximumf %38, %39 : vector<8x256xf32>
    %41 = arith.truncf %40 : vector<8x256xf32> to vector<8x256xbf16>
    %c4 = arith.constant 4 : index
    %c0_29 = arith.constant 0 : index
    %c0_30 = arith.constant 0 : index
    %42 = vector.load %arg2[%c4, %c0_29, %c0_30] : memref<7x256x256xbf16, #tpu.memory_space<vmem>>, vector<1x256x256xbf16>
    %43 = vector.shape_cast %42 : vector<1x256x256xbf16> to vector<256x256xbf16>
    %cst_31 = arith.constant dense<0.000000e+00> : vector<8x256xf32>
    %44 = tpu.matmul %41, %43, %cst_31 {dimension_numbers = #tpu.dot_dimension_numbers<[1], [0], [0], [1], [0, 0, 1, 1], [], []>} : vector<8x256xbf16>, vector<256x256xbf16>, vector<8x256xf32> -> vector<8x256xf32>
    %c4_32 = arith.constant 4 : index
    %c0_33 = arith.constant 0 : index
    %c0_34 = arith.constant 0 : index
    %45 = vector.load %arg3[%c4_32, %c0_33, %c0_34] : memref<7x1x256xf32, #tpu.memory_space<vmem>>, vector<1x1x256xf32>
    %46 = vector.shape_cast %45 : vector<1x1x256xf32> to vector<1x256xf32>
    %47 = vector.broadcast %46 : vector<1x256xf32> to vector<8x256xf32>
    %48 = arith.addf %44, %47 : vector<8x256xf32>
    %cst_35 = arith.constant 0.000000e+00 : f32
    %49 = vector.broadcast %cst_35 : f32 to vector<8x256xf32>
    %50 = arith.maximumf %48, %49 : vector<8x256xf32>
    %51 = arith.truncf %50 : vector<8x256xf32> to vector<8x256xbf16>
    %c5 = arith.constant 5 : index
    %c0_36 = arith.constant 0 : index
    %c0_37 = arith.constant 0 : index
    %52 = vector.load %arg2[%c5, %c0_36, %c0_37] : memref<7x256x256xbf16, #tpu.memory_space<vmem>>, vector<1x256x256xbf16>
    %53 = vector.shape_cast %52 : vector<1x256x256xbf16> to vector<256x256xbf16>
    %cst_38 = arith.constant dense<0.000000e+00> : vector<8x256xf32>
    %54 = tpu.matmul %51, %53, %cst_38 {dimension_numbers = #tpu.dot_dimension_numbers<[1], [0], [0], [1], [0, 0, 1, 1], [], []>} : vector<8x256xbf16>, vector<256x256xbf16>, vector<8x256xf32> -> vector<8x256xf32>
    %c5_39 = arith.constant 5 : index
    %c0_40 = arith.constant 0 : index
    %c0_41 = arith.constant 0 : index
    %55 = vector.load %arg3[%c5_39, %c0_40, %c0_41] : memref<7x1x256xf32, #tpu.memory_space<vmem>>, vector<1x1x256xf32>
    %56 = vector.shape_cast %55 : vector<1x1x256xf32> to vector<1x256xf32>
    %57 = vector.broadcast %56 : vector<1x256xf32> to vector<8x256xf32>
    %58 = arith.addf %54, %57 : vector<8x256xf32>
    %cst_42 = arith.constant 0.000000e+00 : f32
    %59 = vector.broadcast %cst_42 : f32 to vector<8x256xf32>
    %60 = arith.maximumf %58, %59 : vector<8x256xf32>
    %61 = arith.truncf %60 : vector<8x256xf32> to vector<8x256xbf16>
    %c6 = arith.constant 6 : index
    %c0_43 = arith.constant 0 : index
    %c0_44 = arith.constant 0 : index
    %62 = vector.load %arg2[%c6, %c0_43, %c0_44] : memref<7x256x256xbf16, #tpu.memory_space<vmem>>, vector<1x256x256xbf16>
    %63 = vector.shape_cast %62 : vector<1x256x256xbf16> to vector<256x256xbf16>
    %cst_45 = arith.constant dense<0.000000e+00> : vector<8x256xf32>
    %64 = tpu.matmul %61, %63, %cst_45 {dimension_numbers = #tpu.dot_dimension_numbers<[1], [0], [0], [1], [0, 0, 1, 1], [], []>} : vector<8x256xbf16>, vector<256x256xbf16>, vector<8x256xf32> -> vector<8x256xf32>
    %c6_46 = arith.constant 6 : index
    %c0_47 = arith.constant 0 : index
    %c0_48 = arith.constant 0 : index
    %65 = vector.load %arg3[%c6_46, %c0_47, %c0_48] : memref<7x1x256xf32, #tpu.memory_space<vmem>>, vector<1x1x256xf32>
    %66 = vector.shape_cast %65 : vector<1x1x256xf32> to vector<1x256xf32>
    %67 = vector.broadcast %66 : vector<1x256xf32> to vector<8x256xf32>
    %68 = arith.addf %64, %67 : vector<8x256xf32>
    %c0_49 = arith.constant 0 : index
    %c0_50 = arith.constant 0 : index
    %69 = vector.load %arg4[%c0_49, %c0_50] : memref<8x256xf32, #tpu.memory_space<vmem>>, vector<8x256xf32>
    tpu.vector_store %arg4[%c0_49, %c0_50], %68 {strides = array<i32>} : memref<8x256xf32, #tpu.memory_space<vmem>>, vector<8x256xf32>,
    return
  }
  func.func @transform_0(%arg0: i32) -> (i32, i32) {
    %c0_i32 = arith.constant 0 : i32
    %c0_i32_0 = arith.constant 0 : i32
    %c0_i32_1 = arith.constant 0 : i32
    return %c0_i32, %c0_i32_0 : i32, i32
  }
  func.func @transform_1(%arg0: i32) -> (i32, i32, i32) {
    %c0_i32 = arith.constant 0 : i32
    %c0_i32_0 = arith.constant 0 : i32
    %c0_i32_1 = arith.constant 0 : i32
    %c0_i32_2 = arith.constant 0 : i32
    return %c0_i32, %c0_i32_0, %c0_i32_1 : i32, i32, i32
  }
  func.func @transform_2(%arg0: i32) -> (i32, i32, i32) {
    %c0_i32 = arith.constant 0 : i32
    %c0_i32_0 = arith.constant 0 : i32
    %c0_i32_1 = arith.constant 0 : i32
    %c0_i32_2 = arith.constant 0 : i32
    return %c0_i32, %c0_i32_0, %c0_i32_1 : i32, i32, i32
  }
  func.func @transform_3(%arg0: i32) -> (i32, i32) {
    %c0_i32 = arith.constant 0 : i32
    %c0_i32_0 = arith.constant 0 : i32
    %c0_i32_1 = arith.constant 0 : i32
    return %c0_i32, %c0_i32_0 : i32, i32
  }
}

</mosaic_0001>

<bundles_post_ra>
// kernel: net_fc_forward_fused.1
= control target key start
LH: loop header
LB: loop body
LE: loop exit
PB: predicated region body
PF: predicated region fallthrough
CT: control target
= control target key end

     0   :  { %8 = vsyncpa [#allocation3], 0  ;;  %s2982_s15 = smov [#allocation2]   ;;  %s2983_s17 = smov 128   ;;  %s3041_s0 = inlined_call_operand.vmem [shape: f32[8,256], index: 0, kind: input, shape index: {}]   ;;  %s3042_s1 = inlined_call_operand.hbm [shape: bf16[7,256,256], index: 1, kind: input, shape index: {}]   ;;  %s3043_s2 = inlined_call_operand.vmem [shape: f32[7,1,256], index: 2, kind: input, shape index: {}]   ;;  %s3044_s3 = inlined_call_operand.vmem [shape: f32[8,256], index: 3, kind: output, shape index: {}]  }
   0x1   :  { %s15_s14 = sshll.u32 %s3042_s1, 4  ;;  %s17_s16 = sshll.u32 %s2982_s15, 4  ;;  %s16_s14 = int_to_ptr.hbm [resolvable:$true] %s15_s14  ;;  %s18_s16 = int_to_ptr.vmem [resolvable:$true] %s17_s16 }
   0x2   :  { %s2984_s18 = smov 8  }
   0x3   :  { %23 = dma.hbm_to_vmem [thread:$0]  %s16_s14, 28672, %s18_s16, [#allocation3], %s2983_s17, %s2983_s17, %s2984_s18  }
   0x4   :  { %2980 = dma.done.wait [#allocation3], 28672  }
   0x5   :  { %2981 = vsyncadd [#allocation3], 4294938624  ;;  %v1885_v0 = vld [vmem:[#allocation2 + $0x70] sm:$0xf]  ;;  %v2744_v1 = vld [vmem:[#allocation2 + $0x74] sm:$0xf0] }
   0x6   :  { %v1949_v2 = vld [vmem:[#allocation2 + $0xf0] sm:$0xf]  ;;  %v1886_v3 = vor.u32 %v2744_v1, %v1885_v0  ;;  %v2760_v4 = vld [vmem:[#allocation2 + $0xf4] sm:$0xf0]  ;;  %v2743_v5 = vld [vmem:[#allocation2 + $0x74] sm:$0xf] }
   0x7   :  { %v1887_v6 = vld [vmem:[#allocation2 + $0x78] sm:$0xf0]  ;;  %v1950_v7 = vor.u32 %v2760_v4, %v1949_v2  ;;  %v2759_v9 = vld [vmem:[#allocation2 + $0xf4] sm:$0xf]  ;;  %v1877_v11 = vld [vmem:[#allocation2 + $0x60] sm:$0xf] }
   0x8   :  { %v1890_v8 = vor.u32 %v2743_v5, %v1887_v6  ;;  %v1951_v10 = vld [vmem:[#allocation2 + $0xf8] sm:$0xf0]  ;;  %232 = vmatpush.bf16.msra.mxu0 %v1886_v3  ;;  %v2742_v13 = vld [vmem:[#allocation2 + $0x64] sm:$0xf0]  ;;  %v1941_v14 = vld [vmem:[#allocation2 + $0xe0] sm:$0xf] }
   0x9   :  { %v1954_v12 = vor.u32 %v2759_v9, %v1951_v10  ;;  %v2758_v15 = vld [vmem:[#allocation2 + $0xe4] sm:$0xf0]  ;;  %245 = vmatpush.bf16.msra.mxu1 %v1950_v7  ;;  %v1878_v16 = vor.u32 %v2742_v13, %v1877_v11  ;;  %v2741_v18 = vld [vmem:[#allocation2 + $0x64] sm:$0xf]  ;;  %v1879_v19 = vld [vmem:[#allocation2 + $0x68] sm:$0xf0] }
   0xa   :  { %258 = vmatpush.bf16.msra.mxu2 %v1890_v8  ;;  %v1942_v17 = vor.u32 %v2758_v15, %v1941_v14  ;;  %v2757_v20 = vld [vmem:[#allocation2 + $0xe4] sm:$0xf]  ;;  %v1882_v21 = vor.u32 %v2741_v18, %v1879_v19  ;;  %v1943_v22 = vld [vmem:[#allocation2 + $0xe8] sm:$0xf0]  ;;  %v1869_v23 = vld [vmem:[#allocation2 + $0x50] sm:$0xf] }
   0xb   :  { %271 = vmatpush.bf16.msra.mxu3 %v1954_v12  ;;  %v2740_v24 = vld [vmem:[#allocation2 + $0x54] sm:$0xf0]  ;;  %v1946_v25 = vor.u32 %v2757_v20, %v1943_v22  ;;  %v1933_v26 = vld [vmem:[#allocation2 + $0xd0] sm:$0xf]  ;;  %v2739_v28 = vld [vmem:[#allocation2 + $0x54] sm:$0xf] }
   0xc   :  { %v2756_v27 = vld [vmem:[#allocation2 + $0xd4] sm:$0xf0]  ;;  %233 = vmatpush.bf16.msra.mxu0 %v1878_v16  ;;  %v1870_v29 = vor.u32 %v2740_v24, %v1869_v23  ;;  %v1871_v30 = vld [vmem:[#allocation2 + $0x58] sm:$0xf0]  ;;  %v2755_v31 = vld [vmem:[#allocation2 + $0xd4] sm:$0xf] }
   0xd   :  { %v1935_v32 = vld [vmem:[#allocation2 + $0xd8] sm:$0xf0]  ;;  %246 = vmatpush.bf16.msra.mxu1 %v1942_v17  ;;  %v1934_v33 = vor.u32 %v2756_v27, %v1933_v26  ;;  %v1874_v34 = vor.u32 %v2739_v28, %v1871_v30  ;;  %v1861_v35 = vld [vmem:[#allocation2 + $0x40] sm:$0xf]  ;;  %v2738_v36 = vld [vmem:[#allocation2 + $0x44] sm:$0xf0] }
   0xe   :  { %259 = vmatpush.bf16.msra.mxu2 %v1882_v21  ;;  %v1925_v37 = vld [vmem:[#allocation2 + $0xc0] sm:$0xf]  ;;  %v1938_v38 = vor.u32 %v2755_v31, %v1935_v32  ;;  %v2754_v39 = vld [vmem:[#allocation2 + $0xc4] sm:$0xf0]  ;;  %v2737_v40 = vld [vmem:[#allocation2 + $0x44] sm:$0xf]  ;;  %v1862_v44 = vor.u32 %v2738_v36, %v1861_v35 }
   0xf   :  { %272 = vmatpush.bf16.msra.mxu3 %v1946_v25  ;;  %v1863_v41 = vld [vmem:[#allocation2 + $0x48] sm:$0xf0]  ;;  %v2753_v42 = vld [vmem:[#allocation2 + $0xc4] sm:$0xf]  ;;  %v1926_v45 = vor.u32 %v2754_v39, %v1925_v37  ;;  %v1853_v47 = vld [vmem:[#allocation2 + $0x30] sm:$0xf] }
  0x10   :  { %v1927_v43 = vld [vmem:[#allocation2 + $0xc8] sm:$0xf0]  ;;  %234 = vmatpush.bf16.msra.mxu0 %v1870_v29  ;;  %v1866_v46 = vor.u32 %v2737_v40, %v1863_v41  ;;  %v2736_v48 = vld [vmem:[#allocation2 + $0x34] sm:$0xf0]  ;;  %v1917_v49 = vld [vmem:[#allocation2 + $0xb0] sm:$0xf] }
  0x11   :  { %247 = vmatpush.bf16.msra.mxu1 %v1934_v33  ;;  %v1930_v50 = vor.u32 %v2753_v42, %v1927_v43  ;;  %v2752_v51 = vld [vmem:[#allocation2 + $0xb4] sm:$0xf0]  ;;  %v2735_v52 = vld [vmem:[#allocation2 + $0x34] sm:$0xf]  ;;  %v1855_v53 = vld [vmem:[#allocation2 + $0x38] sm:$0xf0]  ;;  %v1854_v56 = vor.u32 %v2736_v48, %v1853_v47 }
  0x12   :  { %260 = vmatpush.bf16.msra.mxu2 %v1874_v34  ;;  %v2751_v54 = vld [vmem:[#allocation2 + $0xb4] sm:$0xf]  ;;  %v1919_v55 = vld [vmem:[#allocation2 + $0xb8] sm:$0xf0]  ;;  %v1918_v57 = vor.u32 %v2752_v51, %v1917_v49  ;;  %v1858_v58 = vor.u32 %v2735_v52, %v1855_v53  ;;  %v1845_v59 = vld [vmem:[#allocation2 + $0x20] sm:$0xf] }
  0x13   :  { %273 = vmatpush.bf16.msra.mxu3 %v1938_v38  ;;  %v2734_v60 = vld [vmem:[#allocation2 + $0x24] sm:$0xf0]  ;;  %v1909_v61 = vld [vmem:[#allocation2 + $0xa0] sm:$0xf]  ;;  %v1922_v62 = vor.u32 %v2751_v54, %v1919_v55  ;;  %v2733_v0 = vld [vmem:[#allocation2 + $0x24] sm:$0xf] }
  0x14   :  { %235 = vmatpush.bf16.msra.mxu0 %v1862_v44  ;;  %v2750_v63 = vld [vmem:[#allocation2 + $0xa4] sm:$0xf0]  ;;  %v1847_v1 = vld [vmem:[#allocation2 + $0x28] sm:$0xf0]  ;;  %v2749_v2 = vld [vmem:[#allocation2 + $0xa4] sm:$0xf]  ;;  %v1846_v4 = vor.u32 %v2734_v60, %v1845_v59 }
  0x15   :  { %248 = vmatpush.bf16.msra.mxu1 %v1926_v45  ;;  %v1911_v3 = vld [vmem:[#allocation2 + $0xa8] sm:$0xf0]  ;;  %v1910_v5 = vor.u32 %v2750_v63, %v1909_v61  ;;  %v1850_v6 = vor.u32 %v2733_v0, %v1847_v1  ;;  %v1837_v7 = vld [vmem:[#allocation2 + $0x10] sm:$0xf]  ;;  %v2732_v8 = vld [vmem:[#allocation2 + $0x14] sm:$0xf0] }
  0x16   :  { %261 = vmatpush.bf16.msra.mxu2 %v1866_v46  ;;  %v1901_v9 = vld [vmem:[#allocation2 + $0x90] sm:$0xf]  ;;  %v1914_v10 = vor.u32 %v2749_v2, %v1911_v3  ;;  %v2748_v11 = vld [vmem:[#allocation2 + $0x94] sm:$0xf0]  ;;  %v2731_v12 = vld [vmem:[#allocation2 + $0x14] sm:$0xf]  ;;  %v1838_v16 = vor.u32 %v2732_v8, %v1837_v7 }
  0x17   :  { %274 = vmatpush.bf16.msra.mxu3 %v1930_v50  ;;  %v1839_v13 = vld [vmem:[#allocation2 + $0x18] sm:$0xf0]  ;;  %v2747_v14 = vld [vmem:[#allocation2 + $0x94] sm:$0xf]  ;;  %v1829_v17 = vld [vmem:[#allocation2] sm:$0xf]  ;;  %v1902_v18 = vor.u32 %v2748_v11, %v1901_v9 }
  0x18   :  { %236 = vmatpush.bf16.msra.mxu0 %v1854_v56  ;;  %v1903_v15 = vld [vmem:[#allocation2 + $0x98] sm:$0xf0]  ;;  %v1842_v19 = vor.u32 %v2731_v12, %v1839_v13  ;;  %v2730_v20 = vld [vmem:[#allocation2 + $0x4] sm:$0xf0]  ;;  %v1893_v21 = vld [vmem:[#allocation2 + $0x80] sm:$0xf] }
  0x19   :  { %249 = vmatpush.bf16.msra.mxu1 %v1918_v57  ;;  %v2746_v22 = vld [vmem:[#allocation2 + $0x84] sm:$0xf0]  ;;  %v1906_v23 = vor.u32 %v2747_v14, %v1903_v15  ;;  %v2729_v24 = vld [vmem:[#allocation2 + $0x4] sm:$0xf]  ;;  %v1831_v25 = vld [vmem:[#allocation2 + $0x8] sm:$0xf0]  ;;  %v1830_v30 = vor.u32 %v2730_v20, %v1829_v17 }
  0x1a   :  { %262 = vmatpush.bf16.msra.mxu2 %v1858_v58  ;;  %v2745_v26 = vld [vmem:[#allocation2 + $0x84] sm:$0xf]  ;;  %v1895_v27 = vld [vmem:[#allocation2 + $0x88] sm:$0xf0]  ;;  %v2014_v28 = vld [vmem:[#allocation2 + $0x170] sm:$0xf]  ;;  %v1894_v34 = vor.u32 %v2746_v22, %v1893_v21  ;;  %v1834_v35 = vor.u32 %v2729_v24, %v1831_v25 }
  0x1b   :  { %275 = vmatpush.bf16.msra.mxu3 %v1922_v62  ;;  %v2776_v29 = vld [vmem:[#allocation2 + $0x174] sm:$0xf0]  ;;  %v30_v31 = vld [vmem:[%s3041_s0] sm:$0xff]  ;;  %v2775_v32 = vld [vmem:[#allocation2 + $0x174] sm:$0xf]  ;;  %v1898_v37 = vor.u32 %v2745_v26, %v1895_v27 }
  0x1c   :  { %237 = vmatpush.bf16.msra.mxu0 %v1846_v4  ;;  %v2016_v33 = vld [vmem:[#allocation2 + $0x178] sm:$0xf0]  ;;  %v31_v36 = vld [vmem:[%s3041_s0 + $0x8] sm:$0xff]  ;;  %v2015_v38 = vor.u32 %v2776_v29, %v2014_v28  ;;  %v2006_v39 = vld [vmem:[#allocation2 + $0x160] sm:$0xf]  ;;  %v32_v42 = vpack.c.bf16 %v30_v31, %v30_v31 }
  0x1d   :  { %250 = vmatpush.bf16.msra.mxu1 %v1910_v5  ;;  %v2078_v40 = vld [vmem:[#allocation2 + $0x1f0] sm:$0xf]  ;;  %v2792_v41 = vld [vmem:[#allocation2 + $0x1f4] sm:$0xf0]  ;;  %v2019_v43 = vor.u32 %v2775_v32, %v2016_v33  ;;  %v2774_v44 = vld [vmem:[#allocation2 + $0x164] sm:$0xf0]  ;;  %v33_v47 = vpack.c.bf16 %v31_v36, %v31_v36 }
  0x1e   :  { %263 = vmatpush.bf16.msra.mxu2 %v1850_v6  ;;  %v2791_v45 = vld [vmem:[#allocation2 + $0x1f4] sm:$0xf]  ;;  %v2080_v46 = vld [vmem:[#allocation2 + $0x1f8] sm:$0xf0]  ;;  %v2773_v48 = vld [vmem:[#allocation2 + $0x164] sm:$0xf]  ;;  %v2079_v50 = vor.u32 %v2792_v41, %v2078_v40  ;;  %v2007_v51 = vor.u32 %v2774_v44, %v2006_v39 }
  0x1f   :  { %276 = vmatpush.bf16.msra.mxu3 %v1914_v10  ;;  %v2008_v49 = vld [vmem:[#allocation2 + $0x168] sm:$0xf0]  ;;  %v2083_v52 = vor.u32 %v2791_v45, %v2080_v46  ;;  %v1998_v53 = vld [vmem:[#allocation2 + $0x150] sm:$0xf]  ;;  %v2070_v54 = vld [vmem:[#allocation2 + $0x1e0] sm:$0xf] }
  0x20   :  { %238 = vmatpush.bf16.msra.mxu0 %v1838_v16  ;;  %v2790_v55 = vld [vmem:[#allocation2 + $0x1e4] sm:$0xf0]  ;;  %v2011_v56 = vor.u32 %v2773_v48, %v2008_v49  ;;  %v2772_v57 = vld [vmem:[#allocation2 + $0x154] sm:$0xf0]  ;;  %v2789_v58 = vld [vmem:[#allocation2 + $0x1e4] sm:$0xf] }
  0x21   :  { %251 = vmatpush.bf16.msra.mxu1 %v1902_v18  ;;  %v2072_v59 = vld [vmem:[#allocation2 + $0x1e8] sm:$0xf0]  ;;  %v2771_v60 = vld [vmem:[#allocation2 + $0x154] sm:$0xf]  ;;  %v2000_v61 = vld [vmem:[#allocation2 + $0x158] sm:$0xf0]  ;;  %v2071_v62 = vor.u32 %v2790_v55, %v2070_v54  ;;  %v1999_v63 = vor.u32 %v2772_v57, %v1998_v53 }
  0x22   :  { %264 = vmatpush.bf16.msra.mxu2 %v1842_v19  ;;  %v2075_v0 = vor.u32 %v2789_v58, %v2072_v59  ;;  %v1990_v1 = vld [vmem:[#allocation2 + $0x140] sm:$0xf]  ;;  %v2062_v2 = vld [vmem:[#allocation2 + $0x1d0] sm:$0xf]  ;;  %v2788_v3 = vld [vmem:[#allocation2 + $0x1d4] sm:$0xf0]  ;;  %v2003_v4 = vor.u32 %v2771_v60, %v2000_v61 }
  0x23   :  { %277 = vmatpush.bf16.msra.mxu3 %v1906_v23  ;;  %v2770_v5 = vld [vmem:[#allocation2 + $0x144] sm:$0xf0]  ;;  %v2787_v6 = vld [vmem:[#allocation2 + $0x1d4] sm:$0xf]  ;;  %v2064_v7 = vld [vmem:[#allocation2 + $0x1d8] sm:$0xf0]  ;;  %v2063_v10 = vor.u32 %v2788_v3, %v2062_v2 }
  0x24   :  { %239 = vmatpush.bf16.msra.mxu0 %v1830_v30  ;;  %v2769_v8 = vld [vmem:[#allocation2 + $0x144] sm:$0xf]  ;;  %v1992_v9 = vld [vmem:[#allocation2 + $0x148] sm:$0xf0]  ;;  %v1991_v11 = vor.u32 %v2770_v5, %v1990_v1  ;;  %v2067_v12 = vor.u32 %v2787_v6, %v2064_v7  ;;  %v1982_v13 = vld [vmem:[#allocation2 + $0x130] sm:$0xf] }
  0x25   :  { %252 = vmatpush.bf16.msra.mxu1 %v1894_v34  ;;  %v2054_v14 = vld [vmem:[#allocation2 + $0x1c0] sm:$0xf]  ;;  %v2786_v15 = vld [vmem:[#allocation2 + $0x1c4] sm:$0xf0]  ;;  %v1995_v16 = vor.u32 %v2769_v8, %v1992_v9  ;;  %v2768_v17 = vld [vmem:[#allocation2 + $0x134] sm:$0xf0] }
  0x26   :  { %265 = vmatpush.bf16.msra.mxu2 %v1834_v35  ;;  %v2785_v18 = vld [vmem:[#allocation2 + $0x1c4] sm:$0xf]  ;;  %v2056_v19 = vld [vmem:[#allocation2 + $0x1c8] sm:$0xf0]  ;;  %v2767_v20 = vld [vmem:[#allocation2 + $0x134] sm:$0xf]  ;;  %v2055_v22 = vor.u32 %v2786_v15, %v2054_v14  ;;  %v1983_v23 = vor.u32 %v2768_v17, %v1982_v13 }
  0x27   :  { %278 = vmatpush.bf16.msra.mxu3 %v1898_v37  ;;  %240 = vmatmul.bf16.vlgmr.msra.gmra.mxu0 %v32_v42  ;;  %v1984_v21 = vld [vmem:[#allocation2 + $0x138] sm:$0xf0]  ;;  %v2059_v24 = vor.u32 %v2785_v18, %v2056_v19  ;;  %v1974_v26 = vld [vmem:[#allocation2 + $0x120] sm:$0xf]  ;;  %v2766_v27 = vld [vmem:[#allocation2 + $0x124] sm:$0xf0] }
  0x28   :  { %488 = vmatpush.bf16.msrb.mxu0 %v2015_v38  ;;  %253 = vmatmul.bf16.vlgmr.msra.gmra.mxu1 %v33_v47  ;;  %v1987_v25 = vor.u32 %v2767_v20, %v1984_v21  ;;  %v2765_v28 = vld [vmem:[#allocation2 + $0x124] sm:$0xf]  ;;  %v1976_v29 = vld [vmem:[#allocation2 + $0x128] sm:$0xf0]  ;;  %v1975_v30 = vor.u32 %v2766_v27, %v1974_v26  ;;  %v2046_v32 = vld [vmem:[#allocation2 + $0x1b0] sm:$0xf] }
  0x29   :  { %266 = vmatmul.bf16.vlgmr.msra.gmra.mxu2 %v32_v42  ;;  %501 = vmatpush.bf16.msrb.mxu1 %v2079_v50  ;;  %v1979_v31 = vor.u32 %v2765_v28, %v1976_v29  ;;  %v2784_v33 = vld [vmem:[#allocation2 + $0x1b4] sm:$0xf0]  ;;  %v2783_v34 = vld [vmem:[#allocation2 + $0x1b4] sm:$0xf]  ;;  %v2048_v36 = vld [vmem:[#allocation2 + $0x1b8] sm:$0xf0] }
  0x2a   :  { %514 = vmatpush.bf16.msrb.mxu2 %v2019_v43  ;;  %279 = vmatmul.bf16.vlgmr.msra.gmra.mxu3 %v33_v47  ;;  %v2047_v35 = vor.u32 %v2784_v33, %v2046_v32  ;;  %v2051_v37 = vor.u32 %v2783_v34, %v2048_v36  ;;  %v1966_v38 = vld [vmem:[#allocation2 + $0x110] sm:$0xf]  ;;  %v2764_v39 = vld [vmem:[#allocation2 + $0x114] sm:$0xf0]  ;;  %v2763_v40 = vld [vmem:[#allocation2 + $0x114] sm:$0xf] }
  0x2b   :  { %527 = vmatpush.bf16.msrb.mxu3 %v2083_v52  ;;  %v1967_v41 = vor.u32 %v2764_v39, %v1966_v38  ;;  %v1968_v42 = vld [vmem:[#allocation2 + $0x118] sm:$0xf0]  ;;  %v2038_v44 = vld [vmem:[#allocation2 + $0x1a0] sm:$0xf]  ;;  %v2782_v45 = vld [vmem:[#allocation2 + $0x1a4] sm:$0xf0] }
  0x2c   :  { %489 = vmatpush.bf16.msrb.mxu0 %v2007_v51  ;;  %v1971_v43 = vor.u32 %v2763_v40, %v1968_v42  ;;  %v2781_v46 = vld [vmem:[#allocation2 + $0x1a4] sm:$0xf]  ;;  %v2039_v47 = vor.u32 %v2782_v45, %v2038_v44  ;;  %v2040_v48 = vld [vmem:[#allocation2 + $0x1a8] sm:$0xf0]  ;;  %v1958_v50 = vld [vmem:[#allocation2 + $0x100] sm:$0xf] }
  0x2d   :  { %502 = vmatpush.bf16.msrb.mxu1 %v2071_v62  ;;  %v2043_v49 = vor.u32 %v2781_v46, %v2040_v48  ;;  %v2762_v51 = vld [vmem:[#allocation2 + $0x104] sm:$0xf0]  ;;  %v2761_v52 = vld [vmem:[#allocation2 + $0x104] sm:$0xf]  ;;  %v1960_v54 = vld [vmem:[#allocation2 + $0x108] sm:$0xf0] }
  0x2e   :  { %515 = vmatpush.bf16.msrb.mxu2 %v2011_v56  ;;  %v1959_v53 = vor.u32 %v2762_v51, %v1958_v50  ;;  %v1963_v55 = vor.u32 %v2761_v52, %v1960_v54  ;;  %v2030_v56 = vld [vmem:[#allocation2 + $0x190] sm:$0xf]  ;;  %v2780_v57 = vld [vmem:[#allocation2 + $0x194] sm:$0xf0]  ;;  %v2779_v59 = vld [vmem:[#allocation2 + $0x194] sm:$0xf] }
  0x2f   :  { %528 = vmatpush.bf16.msrb.mxu3 %v2075_v0  ;;  %v2031_v58 = vor.u32 %v2780_v57, %v2030_v56  ;;  %v2032_v60 = vld [vmem:[#allocation2 + $0x198] sm:$0xf0]  ;;  %v2022_v62 = vld [vmem:[#allocation2 + $0x180] sm:$0xf]  ;;  %v2777_v0 = vld [vmem:[#allocation2 + $0x184] sm:$0xf] }
  0x30   :  { %490 = vmatpush.bf16.msrb.mxu0 %v1999_v63  ;;  %v2035_v61 = vor.u32 %v2779_v59, %v2032_v60  ;;  %v2778_v63 = vld [vmem:[#allocation2 + $0x184] sm:$0xf0]  ;;  %v2024_v2 = vld [vmem:[#allocation2 + $0x188] sm:$0xf0]  ;;  %v2808_v5 = vld [vmem:[#allocation2 + $0x274] sm:$0xf0] }
  0x31   :  { %503 = vmatpush.bf16.msrb.mxu1 %v2063_v10  ;;  %v2023_v1 = vor.u32 %v2778_v63, %v2022_v62  ;;  %v2027_v3 = vor.u32 %v2777_v0, %v2024_v2  ;;  %v2807_v6 = vld [vmem:[#allocation2 + $0x274] sm:$0xf]  ;;  %v2145_v8 = vld [vmem:[#allocation2 + $0x278] sm:$0xf0]  ;;  %v2135_v9 = vld [vmem:[#allocation2 + $0x260] sm:$0xf] }
  0x32   :  { %516 = vmatpush.bf16.msrb.mxu2 %v2003_v4  ;;  %v2143_v4 = vld [vmem:[#allocation2 + $0x270] sm:$0xf]  ;;  %v2806_v10 = vld [vmem:[#allocation2 + $0x264] sm:$0xf0]  ;;  %v2137_v13 = vld [vmem:[#allocation2 + $0x268] sm:$0xf0] }
  0x33   :  { %529 = vmatpush.bf16.msrb.mxu3 %v2067_v12  ;;  %v2144_v7 = vor.u32 %v2808_v5, %v2143_v4  ;;  %v2805_v12 = vld [vmem:[#allocation2 + $0x264] sm:$0xf]  ;;  %v2207_v14 = vld [vmem:[#allocation2 + $0x2f0] sm:$0xf]  ;;  %v2136_v15 = vor.u32 %v2806_v10, %v2135_v9  ;;  %v2823_v17 = vld [vmem:[#allocation2 + $0x2f4] sm:$0xf] }
  0x34   :  { %491 = vmatpush.bf16.msrb.mxu0 %v1991_v11  ;;  %v2148_v11 = vor.u32 %v2807_v6, %v2145_v8  ;;  %v2209_v18 = vld [vmem:[#allocation2 + $0x2f8] sm:$0xf0]  ;;  %v2140_v19 = vor.u32 %v2805_v12, %v2137_v13  ;;  %v2199_v26 = vld [vmem:[#allocation2 + $0x2e0] sm:$0xf]  ;;  %v2822_v27 = vld [vmem:[#allocation2 + $0x2e4] sm:$0xf0] }
  0x35   :  { %504 = vmatpush.bf16.msrb.mxu1 %v2055_v22  ;;  %v2212_v21 = vor.u32 %v2823_v17, %v2209_v18  ;;  %v2127_v22 = vld [vmem:[#allocation2 + $0x250] sm:$0xf]  ;;  %v2200_v28 = vor.u32 %v2822_v27, %v2199_v26  ;;  %v2821_v29 = vld [vmem:[#allocation2 + $0x2e4] sm:$0xf]  ;;  %v2119_v33 = vld [vmem:[#allocation2 + $0x240] sm:$0xf] }
  0x36   :  { %517 = vmatpush.bf16.msrb.mxu2 %v1995_v16  ;;  %v2824_v16 = vld [vmem:[#allocation2 + $0x2f4] sm:$0xf0]  ;;  %v2802_v34 = vld [vmem:[#allocation2 + $0x244] sm:$0xf0]  ;;  %v2191_v36 = vld [vmem:[#allocation2 + $0x2d0] sm:$0xf] }
  0x37   :  { %530 = vmatpush.bf16.msrb.mxu3 %v2059_v24  ;;  %v2208_v20 = vor.u32 %v2824_v16, %v2207_v14  ;;  %v2803_v24 = vld [vmem:[#allocation2 + $0x254] sm:$0xf]  ;;  %v2801_v39 = vld [vmem:[#allocation2 + $0x244] sm:$0xf]  ;;  %v2121_v40 = vld [vmem:[#allocation2 + $0x248] sm:$0xf0]  ;;  %v2120_v45 = vor.u32 %v2802_v34, %v2119_v33 }
  0x38   :  { %492 = vmatpush.bf16.msrb.mxu0 %v1983_v23  ;;  %v2804_v23 = vld [vmem:[#allocation2 + $0x254] sm:$0xf0]  ;;  %v2819_v38 = vld [vmem:[#allocation2 + $0x2d4] sm:$0xf]  ;;  %v66_v42 = vld [vmem:[%s3043_s2] sm:$0x3]  ;;  %v2124_v46 = vor.u32 %v2801_v39, %v2121_v40 }
  0x39   :  { %505 = vmatpush.bf16.msrb.mxu1 %v2047_v35  ;;  %v2800_v48 = vld [vmem:[#allocation2 + $0x234] sm:$0xf0]  ;;  %v2799_v50 = vld [vmem:[#allocation2 + $0x234] sm:$0xf]  ;;  %v2113_v51 = vld [vmem:[#allocation2 + $0x238] sm:$0xf0] }
  0x3a   :  { %518 = vmatpush.bf16.msrb.mxu2 %v1987_v25  ;;  %v2129_v25 = vld [vmem:[#allocation2 + $0x258] sm:$0xf0]  ;;  %v2116_v54 = vor.u32 %v2799_v50, %v2113_v51  ;;  %v2818_v8 = vld [vmem:[#allocation2 + $0x2c4] sm:$0xf0]  ;;  %v2817_v9 = vld [vmem:[#allocation2 + $0x2c4] sm:$0xf] }
  0x3b   :  { %531 = vmatpush.bf16.msrb.mxu3 %v2051_v37  ;;  %v2132_v35 = vor.u32 %v2803_v24, %v2129_v25  ;;  %v2820_v37 = vld [vmem:[#allocation2 + $0x2d4] sm:$0xf0]  ;;  %v2103_v13 = vld [vmem:[#allocation2 + $0x220] sm:$0xf]  ;;  %v2798_v14 = vld [vmem:[#allocation2 + $0x224] sm:$0xf0] }
  0x3c   :  { %493 = vmatpush.bf16.msrb.mxu0 %v1975_v30  ;;  %v2201_v30 = vld [vmem:[#allocation2 + $0x2e8] sm:$0xf0]  ;;  %v2104_v16 = vor.u32 %v2798_v14, %v2103_v13  ;;  %v2175_v18 = vld [vmem:[#allocation2 + $0x2b0] sm:$0xf]  ;;  %v2796_v26 = vld [vmem:[#allocation2 + $0x214] sm:$0xf0] }
  0x3d   :  { %506 = vmatpush.bf16.msrb.mxu1 %v2039_v47  ;;  %v2204_v32 = vor.u32 %v2821_v29, %v2201_v30  ;;  %v2111_v47 = vld [vmem:[#allocation2 + $0x230] sm:$0xf]  ;;  %v2105_v17 = vld [vmem:[#allocation2 + $0x228] sm:$0xf0]  ;;  %v2795_v27 = vld [vmem:[#allocation2 + $0x214] sm:$0xf] }
  0x3e   :  { %519 = vmatpush.bf16.msrb.mxu2 %v1979_v31  ;;  %v2128_v31 = vor.u32 %v2804_v23, %v2127_v22  ;;  %v2112_v52 = vor.u32 %v2800_v48, %v2111_v47  ;;  %v2815_v22 = vld [vmem:[#allocation2 + $0x2b4] sm:$0xf]  ;;  %v2177_v23 = vld [vmem:[#allocation2 + $0x2b8] sm:$0xf0]  ;;  %v2095_v25 = vld [vmem:[#allocation2 + $0x210] sm:$0xf] }
  0x3f   :  { %532 = vmatpush.bf16.msrb.mxu3 %v2043_v49  ;;  %v68_v49 = vperm.slane %v66_v42, 0  ;;  %v2180_v24 = vor.u32 %v2815_v22, %v2177_v23  ;;  %v2097_v29 = vld [vmem:[#allocation2 + $0x218] sm:$0xf0]  ;;  %v2813_v33 = vld [vmem:[#allocation2 + $0x2a4] sm:$0xf] }
  0x40   :  { %494 = vmatpush.bf16.msrb.mxu0 %v1967_v41  ;;  %v2193_v41 = vld [vmem:[#allocation2 + $0x2d8] sm:$0xf0]  ;;  %v2100_v30 = vor.u32 %v2795_v27, %v2097_v29  ;;  %v2793_v39 = vld [vmem:[#allocation2 + $0x204] sm:$0xf]  ;;  %v2810_v50 = vld [vmem:[#allocation2 + $0x284] sm:$0xf0] }
  0x41   :  { %507 = vmatpush.bf16.msrb.mxu1 %v2031_v58  ;;  %v2196_v44 = vor.u32 %v2819_v38, %v2193_v41  ;;  %v69_v58 = vperm.slane %v66_v42, 1  ;;  %v2794_v38 = vld [vmem:[#allocation2 + $0x204] sm:$0xf0]  ;;  %v2089_v41 = vld [vmem:[#allocation2 + $0x208] sm:$0xf0] }
  0x42   :  { %520 = vmatpush.bf16.msrb.mxu2 %v1971_v43  ;;  %v2192_v43 = vor.u32 %v2820_v37, %v2191_v36  ;;  %v2087_v37 = vld [vmem:[#allocation2 + $0x200] sm:$0xf]  ;;  %v2092_v42 = vor.u32 %v2793_v39, %v2089_v41  ;;  %v2161_v47 = vld [vmem:[#allocation2 + $0x298] sm:$0xf0]  ;;  %v2809_v51 = vld [vmem:[#allocation2 + $0x284] sm:$0xf] }
  0x43   :  { %533 = vmatpush.bf16.msrb.mxu3 %v2035_v61  ;;  %v2088_v40 = vor.u32 %v2794_v38, %v2087_v37  ;;  %v2328_v13 = vld [vmem:[#allocation2 + $0x3e0] sm:$0xf]  ;;  %v2854_v14 = vld [vmem:[#allocation2 + $0x3e4] sm:$0xf0]  ;;  %v2833_v27 = vld [vmem:[#allocation2 + $0x344] sm:$0xf] }
  0x44   :  { %495 = vmatpush.bf16.msrb.mxu0 %v1959_v53  ;;  %v2834_v22 = vld [vmem:[#allocation2 + $0x344] sm:$0xf0]  ;;  %v2322_v29 = vld [vmem:[#allocation2 + $0x3d8] sm:$0xf0]  ;;  %v2832_v37 = vld [vmem:[#allocation2 + $0x334] sm:$0xf0] }
  0x45   :  { %508 = vmatpush.bf16.msrb.mxu1 %v2023_v1  ;;  %v2831_v38 = vld [vmem:[#allocation2 + $0x334] sm:$0xf]  ;;  %v2242_v39 = vld [vmem:[#allocation2 + $0x338] sm:$0xf0] }
  0x46   :  { %521 = vmatpush.bf16.msrb.mxu2 %v1963_v55 }
  0x47   :  { %534 = vmatpush.bf16.msrb.mxu3 %v2027_v3 }
  0x48   :  { %744 = vmatpush.bf16.msra.mxu0 %v2144_v7  ;;  %v2183_v7 = vld [vmem:[#allocation2 + $0x2c0] sm:$0xf] }
  0x49   :  { %757 = vmatpush.bf16.msra.mxu1 %v2208_v20  ;;  %v2184_v10 = vor.u32 %v2818_v8, %v2183_v7 }
  0x4a   :  { %770 = vmatpush.bf16.msra.mxu2 %v2148_v11  ;;  %v2185_v11 = vld [vmem:[#allocation2 + $0x2c8] sm:$0xf0] }
  0x4b   :  { %783 = vmatpush.bf16.msra.mxu3 %v2212_v21  ;;  %v2188_v12 = vor.u32 %v2817_v9, %v2185_v11  ;;  %v2256_v9 = vld [vmem:[#allocation2 + $0x350] sm:$0xf]  ;;  %v2835_v11 = vld [vmem:[#allocation2 + $0x354] sm:$0xf] }
  0x4c   :  { %745 = vmatpush.bf16.msra.mxu0 %v2136_v15  ;;  %v2797_v15 = vld [vmem:[#allocation2 + $0x224] sm:$0xf] }
  0x4d   :  { %758 = vmatpush.bf16.msra.mxu1 %v2200_v28  ;;  %v2108_v20 = vor.u32 %v2797_v15, %v2105_v17  ;;  %v2096_v28 = vor.u32 %v2796_v26, %v2095_v25  ;;  %v2329_v15 = vor.u32 %v2854_v14, %v2328_v13  ;;  %v2330_v17 = vld [vmem:[#allocation2 + $0x3e8] sm:$0xf0]  ;;  %v2852_v25 = vld [vmem:[#allocation2 + $0x3d4] sm:$0xf0]  ;;  %v2851_v26 = vld [vmem:[#allocation2 + $0x3d4] sm:$0xf] }
  0x4e   :  { %771 = vmatpush.bf16.msra.mxu2 %v2140_v19  ;;  %v2816_v19 = vld [vmem:[#allocation2 + $0x2b4] sm:$0xf0]  ;;  %v2827_v14 = vld [vmem:[#allocation2 + $0x314] sm:$0xf] }
  0x4f   :  { %784 = vmatpush.bf16.msra.mxu3 %v2204_v32  ;;  %v2176_v21 = vor.u32 %v2816_v19, %v2175_v18  ;;  %v2814_v32 = vld [vmem:[#allocation2 + $0x2a4] sm:$0xf0]  ;;  %v1955_v18 = vld [vmem:[%s3043_s2 + $0x2] sm:$0x3]  ;;  %v2828_v13 = vld [vmem:[#allocation2 + $0x314] sm:$0xf0] }
  0x50   :  { %746 = vmatpush.bf16.msra.mxu0 %v2128_v31  ;;  %v2167_v31 = vld [vmem:[#allocation2 + $0x2a0] sm:$0xf] }
  0x51   :  { %759 = vmatpush.bf16.msra.mxu1 %v2192_v43  ;;  %v2168_v34 = vor.u32 %v2814_v32, %v2167_v31  ;;  %v2159_v43 = vld [vmem:[#allocation2 + $0x290] sm:$0xf]  ;;  %v2325_v31 = vor.u32 %v2851_v26, %v2322_v29  ;;  %v324_v32 = vperm.slane %v1955_v18, 0  ;;  %v2825_v26 = vld [vmem:[#allocation2 + $0x304] sm:$0xf] }
  0x52   :  { %772 = vmatpush.bf16.msra.mxu2 %v2132_v35  ;;  %v2169_v35 = vld [vmem:[#allocation2 + $0x2a8] sm:$0xf0] }
  0x53   :  { %785 = vmatpush.bf16.msra.mxu3 %v2196_v44  ;;  %v2172_v36 = vor.u32 %v2813_v33, %v2169_v35  ;;  %v2812_v44 = vld [vmem:[#allocation2 + $0x294] sm:$0xf0] }
  0x54   :  { %747 = vmatpush.bf16.msra.mxu0 %v2120_v45  ;;  %v2160_v45 = vor.u32 %v2812_v44, %v2159_v43  ;;  %v325_v43 = vperm.slane %v1955_v18, 1  ;;  %v2296_v18 = vld [vmem:[#allocation2 + $0x3a0] sm:$0xf] }
  0x55   :  { %760 = vmatpush.bf16.msra.mxu1 %v2184_v10  ;;  %v2836_v10 = vld [vmem:[#allocation2 + $0x354] sm:$0xf0] }
  0x56   :  { %773 = vmatpush.bf16.msra.mxu2 %v2124_v46  ;;  %v2811_v46 = vld [vmem:[#allocation2 + $0x294] sm:$0xf]  ;;  %v2257_v19 = vor.u32 %v2836_v10, %v2256_v9  ;;  %v2306_v10 = vld [vmem:[#allocation2 + $0x3b8] sm:$0xf0] }
  0x57   :  { %786 = vmatpush.bf16.msra.mxu3 %v2188_v12  ;;  %v2164_v48 = vor.u32 %v2811_v46, %v2161_v47  ;;  %v2258_v12 = vld [vmem:[#allocation2 + $0x358] sm:$0xf0]  ;;  %v2847_v9 = vld [vmem:[#allocation2 + $0x3b4] sm:$0xf] }
  0x58   :  { %748 = vmatpush.bf16.msra.mxu0 %v2112_v52  ;;  %v2261_v23 = vor.u32 %v2835_v11, %v2258_v12  ;;  %v2309_v11 = vor.u32 %v2847_v9, %v2306_v10  ;;  %v2224_v12 = vld [vmem:[#allocation2 + $0x310] sm:$0xf] }
  0x59   :  { %761 = vmatpush.bf16.msra.mxu1 %v2176_v21  ;;  %v2248_v21 = vld [vmem:[#allocation2 + $0x340] sm:$0xf]  ;;  %v2449_v10 = vld [vmem:[#allocation2 + $0x4d0] sm:$0xf] }
  0x5a   :  { %774 = vmatpush.bf16.msra.mxu2 %v2116_v54 }
  0x5b   :  { %787 = vmatpush.bf16.msra.mxu3 %v2180_v24  ;;  %v2320_v24 = vld [vmem:[#allocation2 + $0x3d0] sm:$0xf] }
  0x5c   :  { %749 = vmatpush.bf16.msra.mxu0 %v2104_v16  ;;  %v2853_v16 = vld [vmem:[#allocation2 + $0x3e4] sm:$0xf] }
  0x5d   :  { %762 = vmatpush.bf16.msra.mxu1 %v2168_v34  ;;  %v2249_v34 = vor.u32 %v2834_v22, %v2248_v21  ;;  %v2845_v21 = vld [vmem:[#allocation2 + $0x3a4] sm:$0xf]  ;;  %v2298_v22 = vld [vmem:[#allocation2 + $0x3a8] sm:$0xf0] }
  0x5e   :  { %775 = vmatpush.bf16.msra.mxu2 %v2108_v20  ;;  %v2333_v20 = vor.u32 %v2853_v16, %v2330_v17  ;;  %v2226_v16 = vld [vmem:[#allocation2 + $0x318] sm:$0xf0] }
  0x5f   :  { %788 = vmatpush.bf16.msra.mxu3 %v2172_v36  ;;  %v2240_v36 = vld [vmem:[#allocation2 + $0x330] sm:$0xf]  ;;  %v2229_v17 = vor.u32 %v2827_v14, %v2226_v16  ;;  %v2379_v14 = vld [vmem:[#allocation2 + $0x448] sm:$0xf0]  ;;  %v2084_v16 = vld [vmem:[%s3043_s2 + $0x4] sm:$0x3] }
  0x60   :  { %750 = vmatpush.bf16.msra.mxu0 %v2096_v28  ;;  %v2250_v28 = vld [vmem:[#allocation2 + $0x348] sm:$0xf0]  ;;  %v2241_v41 = vor.u32 %v2832_v37, %v2240_v36  ;;  %v2280_v36 = vld [vmem:[#allocation2 + $0x380] sm:$0xf]  ;;  %v2842_v37 = vld [vmem:[#allocation2 + $0x384] sm:$0xf0] }
  0x61   :  { %763 = vmatpush.bf16.msra.mxu1 %v2160_v45  ;;  %v2253_v35 = vor.u32 %v2833_v27, %v2250_v28  ;;  %v2218_v28 = vld [vmem:[#allocation2 + $0x308] sm:$0xf0] }
  0x62   :  { %776 = vmatpush.bf16.msra.mxu2 %v2100_v30  ;;  %v2321_v30 = vor.u32 %v2852_v25, %v2320_v24  ;;  %v2216_v24 = vld [vmem:[#allocation2 + $0x300] sm:$0xf]  ;;  %v2826_v25 = vld [vmem:[#allocation2 + $0x304] sm:$0xf0]  ;;  %v2221_v29 = vor.u32 %v2825_v26, %v2218_v28  ;;  %v2371_v26 = vld [vmem:[#allocation2 + $0x438] sm:$0xf0] }
  0x63   :  { %789 = vmatpush.bf16.msra.mxu3 %v2164_v48  ;;  %v2217_v27 = vor.u32 %v2826_v25, %v2216_v24  ;;  %v580_v24 = vperm.slane %v2084_v16, 0  ;;  %v2863_v25 = vld [vmem:[#allocation2 + $0x434] sm:$0xf] }
  0x64   :  { %751 = vmatpush.bf16.msra.mxu0 %v2088_v40  ;;  %v2374_v28 = vor.u32 %v2863_v25, %v2371_v26  ;;  %v2873_v25 = vld [vmem:[#allocation2 + $0x484] sm:$0xf] }
  0x66   :  { %777 = vmatpush.bf16.msra.mxu2 %v2092_v42  ;;  %v2245_v42 = vor.u32 %v2831_v38, %v2242_v39  ;;  %v2841_v38 = vld [vmem:[#allocation2 + $0x384] sm:$0xf]  ;;  %v2281_v39 = vor.u32 %v2842_v37, %v2280_v36 }
  0xa4   :  { %v241_v53 = vpop.f32.mrf.mxu0 }
  0xa5   :  { %v242_v55 = vadd.f32 %v241_v53, %v68_v49  ;;  %v254_v56 = vpop.f32.mrf.mxu1  ;;  %v2151_v49 = vld [vmem:[#allocation2 + $0x280] sm:$0xf]  ;;  %v2153_v53 = vld [vmem:[#allocation2 + $0x288] sm:$0xf0] }
  0xa6   :  { %v2152_v52 = vor.u32 %v2810_v50, %v2151_v49  ;;  %v2156_v54 = vor.u32 %v2809_v51, %v2153_v53 }
  0xa7   :  { %v255_v57 = vadd.f32 %v254_v56, %v242_v55  ;;  %v2272_v55 = vld [vmem:[#allocation2 + $0x370] sm:$0xf]  ;;  %v2840_v56 = vld [vmem:[#allocation2 + $0x374] sm:$0xf0] }
  0xa8   :  { %764 = vmatpush.bf16.msra.mxu1 %v2152_v52  ;;  %790 = vmatpush.bf16.msra.mxu3 %v2156_v54 }
  0xa9   :  { %v284_v59 = vmax.f32 %v255_v57, 0.0  ;;  %v2839_v57 = vld [vmem:[#allocation2 + $0x374] sm:$0xf] }
  0xab   :  { %v286_v60 = vpack.c.bf16 %v284_v59, %v284_v59  ;;  %v2274_v59 = vld [vmem:[#allocation2 + $0x378] sm:$0xf0] }
  0xac   :  { %v267_v61 = vpop.f32.mrf.mxu2  ;;  %v243_v0 = vpop.f32.mrf.mxu0 }
  0xad   :  { %v268_v62 = vadd.f32 %v267_v61, %v69_v58  ;;  %v280_v63 = vpop.f32.mrf.mxu3  ;;  %v256_v1 = vpop.f32.mrf.mxu1  ;;  %496 = vmatmul.bf16.vlgmr.msrb.gmra.mxu0 %v286_v60  ;;  %522 = vmatmul.bf16.vlgmr.msrb.gmra.mxu2 %v286_v60  ;;  %v2273_v58 = vor.u32 %v2840_v56, %v2272_v55  ;;  %v2264_v60 = vld [vmem:[#allocation2 + $0x360] sm:$0xf]  ;;  %v2838_v61 = vld [vmem:[#allocation2 + $0x364] sm:$0xf0]  ;;  %v2266_v0 = vld [vmem:[#allocation2 + $0x368] sm:$0xf0] }
  0xae   :  { %v2336_v1 = vld [vmem:[#allocation2 + $0x3f0] sm:$0xf] }
  0xaf   :  { %v281_v2 = vadd.f32 %v280_v63, %v268_v62  ;;  %v2277_v62 = vor.u32 %v2839_v57, %v2274_v59  ;;  %v2837_v63 = vld [vmem:[#allocation2 + $0x364] sm:$0xf]  ;;  %1000 = vmatpush.bf16.msrb.mxu0 %v2273_v58  ;;  %v2312_v58 = vld [vmem:[#allocation2 + $0x3c0] sm:$0xf]  ;;  %v2850_v59 = vld [vmem:[#allocation2 + $0x3c4] sm:$0xf0] }
  0xb1   :  { %v285_v3 = vmax.f32 %v281_v2, 0.0  ;;  %v2265_v2 = vor.u32 %v2838_v61, %v2264_v60  ;;  %1026 = vmatpush.bf16.msrb.mxu2 %v2277_v62  ;;  %v2849_v60 = vld [vmem:[#allocation2 + $0x3c4] sm:$0xf]  ;;  %v2313_v61 = vor.u32 %v2850_v59, %v2312_v58  ;;  %v2314_v62 = vld [vmem:[#allocation2 + $0x3c8] sm:$0xf0] }
  0xb3   :  { %v287_v4 = vpack.c.bf16 %v285_v3, %v285_v3  ;;  %v2856_v3 = vld [vmem:[#allocation2 + $0x3f4] sm:$0xf0]  ;;  %1001 = vmatpush.bf16.msrb.mxu0 %v2265_v2  ;;  %v2829_v2 = vld [vmem:[#allocation2 + $0x324] sm:$0xf] }
  0xb4   :  { %v269_v5 = vpop.f32.mrf.mxu2  ;;  %v2337_v7 = vor.u32 %v2856_v3, %v2336_v1  ;;  %v2830_v1 = vld [vmem:[#allocation2 + $0x324] sm:$0xf0] }
  0xb5   :  { %v282_v6 = vpop.f32.mrf.mxu3  ;;  %509 = vmatmul.bf16.vlgmr.msrb.gmra.mxu1 %v287_v4  ;;  %535 = vmatmul.bf16.vlgmr.msrb.gmra.mxu3 %v287_v4  ;;  %v2855_v4 = vld [vmem:[#allocation2 + $0x3f4] sm:$0xf]  ;;  %v2338_v5 = vld [vmem:[#allocation2 + $0x3f8] sm:$0xf0] }
  0xb6   :  { %v2269_v6 = vor.u32 %v2837_v63, %v2266_v0  ;;  %v2341_v8 = vor.u32 %v2855_v4, %v2338_v5  ;;  %1013 = vmatpush.bf16.msrb.mxu1 %v2337_v7  ;;  %v2317_v63 = vor.u32 %v2849_v60, %v2314_v62  ;;  %v2232_v0 = vld [vmem:[#allocation2 + $0x320] sm:$0xf]  ;;  %v2234_v4 = vld [vmem:[#allocation2 + $0x328] sm:$0xf0]  ;;  %v2304_v5 = vld [vmem:[#allocation2 + $0x3b0] sm:$0xf] }
  0xb7   :  { %1002 = vmatpush.bf16.msrb.mxu0 %v2257_v19  ;;  %v2233_v3 = vor.u32 %v2830_v1, %v2232_v0  ;;  %v2237_v7 = vor.u32 %v2829_v2, %v2234_v4  ;;  %v2846_v19 = vld [vmem:[#allocation2 + $0x3a4] sm:$0xf0]  ;;  %v2385_v60 = vld [vmem:[#allocation2 + $0x450] sm:$0xf]  ;;  %v2867_v62 = vld [vmem:[#allocation2 + $0x454] sm:$0xf] }
  0xb8   :  { %1039 = vmatpush.bf16.msrb.mxu3 %v2341_v8  ;;  %1027 = vmatpush.bf16.msrb.mxu2 %v2269_v6  ;;  %v2848_v6 = vld [vmem:[#allocation2 + $0x3b4] sm:$0xf0]  ;;  %v2457_v0 = vld [vmem:[#allocation2 + $0x4e0] sm:$0xf]  ;;  %v2886_v1 = vld [vmem:[#allocation2 + $0x4e4] sm:$0xf0] }
  0xb9   :  { %v2305_v8 = vor.u32 %v2848_v6, %v2304_v5  ;;  %v2458_v2 = vor.u32 %v2886_v1, %v2457_v0  ;;  %v2459_v4 = vld [vmem:[#allocation2 + $0x4e8] sm:$0xf0]  ;;  %v2860_v0 = vld [vmem:[#allocation2 + $0x414] sm:$0xf0]  ;;  %v2859_v1 = vld [vmem:[#allocation2 + $0x414] sm:$0xf] }
  0xba   :  { %1014 = vmatpush.bf16.msrb.mxu1 %v2329_v15  ;;  %v2225_v15 = vor.u32 %v2828_v13, %v2224_v12  ;;  %v2883_v12 = vld [vmem:[#allocation2 + $0x4d4] sm:$0xf]  ;;  %v2865_v13 = vld [vmem:[#allocation2 + $0x444] sm:$0xf] }
  0xbb   :  { %1003 = vmatpush.bf16.msrb.mxu0 %v2249_v34  ;;  %v2290_v34 = vld [vmem:[#allocation2 + $0x398] sm:$0xf0] }
  0xbc   :  { %1040 = vmatpush.bf16.msrb.mxu3 %v2333_v20  ;;  %1028 = vmatpush.bf16.msrb.mxu2 %v2261_v23  ;;  %v2297_v20 = vor.u32 %v2846_v19, %v2296_v18  ;;  %v2301_v23 = vor.u32 %v2845_v21, %v2298_v22  ;;  %v2382_v21 = vor.u32 %v2865_v13, %v2379_v14  ;;  %v2369_v22 = vld [vmem:[#allocation2 + $0x430] sm:$0xf]  ;;  %v2857_v13 = vld [vmem:[#allocation2 + $0x404] sm:$0xf] }
  0xbe   :  { %1015 = vmatpush.bf16.msrb.mxu1 %v2321_v30  ;;  %v2288_v30 = vld [vmem:[#allocation2 + $0x390] sm:$0xf] }
  0xbf   :  { %1004 = vmatpush.bf16.msrb.mxu0 %v2241_v41 }
  0xc0   :  { %1041 = vmatpush.bf16.msrb.mxu3 %v2325_v31  ;;  %1029 = vmatpush.bf16.msrb.mxu2 %v2253_v35  ;;  %v2844_v31 = vld [vmem:[#allocation2 + $0x394] sm:$0xf0] }
  0xc2   :  { %1016 = vmatpush.bf16.msrb.mxu1 %v2313_v61  ;;  %v2868_v61 = vld [vmem:[#allocation2 + $0x454] sm:$0xf0] }
  0xc3   :  { %1005 = vmatpush.bf16.msrb.mxu0 %v2233_v3  ;;  %v2885_v3 = vld [vmem:[#allocation2 + $0x4e4] sm:$0xf]  ;;  %v2386_v5 = vor.u32 %v2868_v61, %v2385_v60  ;;  %v2879_v60 = vld [vmem:[#allocation2 + $0x4b4] sm:$0xf]  ;;  %v2435_v61 = vld [vmem:[#allocation2 + $0x4b8] sm:$0xf0] }
  0xc4   :  { %1030 = vmatpush.bf16.msrb.mxu2 %v2245_v42  ;;  %1042 = vmatpush.bf16.msrb.mxu3 %v2317_v63  ;;  %v2401_v42 = vld [vmem:[#allocation2 + $0x470] sm:$0xf]  ;;  %v2387_v63 = vld [vmem:[#allocation2 + $0x458] sm:$0xf0]  ;;  %v2462_v6 = vor.u32 %v2885_v3, %v2459_v4 }
  0xc5   :  { %v2390_v9 = vor.u32 %v2867_v62, %v2387_v63  ;;  %v2438_v62 = vor.u32 %v2879_v60, %v2435_v61  ;;  %v2353_v63 = vld [vmem:[#allocation2 + $0x410] sm:$0xf]  ;;  %v2355_v3 = vld [vmem:[#allocation2 + $0x418] sm:$0xf0] }
  0xc6   :  { %1017 = vmatpush.bf16.msrb.mxu1 %v2305_v8  ;;  %v2866_v8 = vld [vmem:[#allocation2 + $0x444] sm:$0xf0]  ;;  %v2358_v4 = vor.u32 %v2859_v1, %v2355_v3  ;;  %v2578_v61 = vld [vmem:[#allocation2 + $0x5d0] sm:$0xf]  ;;  %v2508_v1 = vld [vmem:[#allocation2 + $0x548] sm:$0xf0] }
  0xc7   :  { %1006 = vmatpush.bf16.msrb.mxu0 %v2225_v15  ;;  %v2451_v15 = vld [vmem:[#allocation2 + $0x4d8] sm:$0xf0]  ;;  %v2213_v3 = vld [vmem:[%s3043_s2 + $0x6] sm:$0x3] }
  0xc8   :  { %1031 = vmatpush.bf16.msrb.mxu2 %v2237_v7  ;;  %1043 = vmatpush.bf16.msrb.mxu3 %v2309_v11  ;;  %v2377_v7 = vld [vmem:[#allocation2 + $0x440] sm:$0xf]  ;;  %v2884_v11 = vld [vmem:[#allocation2 + $0x4d4] sm:$0xf0]  ;;  %v2454_v18 = vor.u32 %v2883_v12, %v2451_v15  ;;  %v2858_v12 = vld [vmem:[#allocation2 + $0x404] sm:$0xf0] }
  0xc9   :  { %v2378_v19 = vor.u32 %v2866_v8, %v2377_v7  ;;  %v2877_v8 = vld [vmem:[#allocation2 + $0x4a4] sm:$0xf]  ;;  %v2347_v15 = vld [vmem:[#allocation2 + $0x408] sm:$0xf0] }
  0xca   :  { %1018 = vmatpush.bf16.msrb.mxu1 %v2297_v20 }
  0xcb   :  { %1007 = vmatpush.bf16.msrb.mxu0 %v2217_v27 }
  0xcc   :  { %1032 = vmatpush.bf16.msrb.mxu2 %v2229_v17  ;;  %1044 = vmatpush.bf16.msrb.mxu3 %v2301_v23  ;;  %v2450_v17 = vor.u32 %v2884_v11, %v2449_v10  ;;  %v2864_v23 = vld [vmem:[#allocation2 + $0x434] sm:$0xf0]  ;;  %v2345_v11 = vld [vmem:[#allocation2 + $0x400] sm:$0xf] }
  0xcd   :  { %v2370_v27 = vor.u32 %v2864_v23, %v2369_v22  ;;  %v2346_v14 = vor.u32 %v2858_v12, %v2345_v11  ;;  %v2409_v23 = vld [vmem:[#allocation2 + $0x480] sm:$0xf]  ;;  %v836_v11 = vperm.slane %v2213_v3, 0  ;;  %v2895_v12 = vld [vmem:[#allocation2 + $0x534] sm:$0xf] }
  0xd0   :  { %1033 = vmatpush.bf16.msrb.mxu2 %v2221_v29 }
 0x12a   :  { %v497_v33 = vpop.f32.mrf.mxu0 }
 0x12b   :  { %v498_v40 = vadd.f32 %v497_v33, %v324_v32  ;;  %v2843_v32 = vld [vmem:[#allocation2 + $0x394] sm:$0xf]  ;;  %v2289_v33 = vor.u32 %v2844_v31, %v2288_v30 }
 0x12c   :  { %v2293_v35 = vor.u32 %v2843_v32, %v2290_v34 }
 0x12d   :  { %1019 = vmatpush.bf16.msrb.mxu1 %v2289_v33  ;;  %v581_v33 = vperm.slane %v2084_v16, 1  ;;  %v2350_v16 = vor.u32 %v2857_v13, %v2347_v15  ;;  %v2500_v13 = vld [vmem:[#allocation2 + $0x538] sm:$0xf0] }
 0x12e   :  { %1045 = vmatpush.bf16.msrb.mxu3 %v2293_v35  ;;  %v2503_v15 = vor.u32 %v2895_v12, %v2500_v13  ;;  %v2905_v12 = vld [vmem:[#allocation2 + $0x584] sm:$0xf] }
 0x130   :  { %v523_v44 = vpop.f32.mrf.mxu2 }
 0x131   :  { %v524_v49 = vadd.f32 %v523_v44, %v325_v43  ;;  %1020 = vmatpush.bf16.msrb.mxu1 %v2281_v39  ;;  %v2872_v43 = vld [vmem:[#allocation2 + $0x474] sm:$0xf0]  ;;  %v2871_v44 = vld [vmem:[#allocation2 + $0x474] sm:$0xf] }
 0x132   :  { %v510_v45 = vpop.f32.mrf.mxu1  ;;  %v499_v47 = vpop.f32.mrf.mxu0 }
 0x133   :  { %v511_v46 = vadd.f32 %v510_v45, %v498_v40  ;;  %v2282_v40 = vld [vmem:[#allocation2 + $0x388] sm:$0xf0]  ;;  %v2402_v45 = vor.u32 %v2872_v43, %v2401_v42  ;;  %v2393_v47 = vld [vmem:[#allocation2 + $0x460] sm:$0xf] }
 0x134   :  { %v2285_v41 = vor.u32 %v2841_v38, %v2282_v40 }
 0x135   :  { %v540_v48 = vmax.f32 %v511_v46, 0.0  ;;  %v2403_v46 = vld [vmem:[#allocation2 + $0x478] sm:$0xf0] }
 0x136   :  { %1046 = vmatpush.bf16.msrb.mxu3 %v2285_v41 }
 0x137   :  { %v542_v50 = vpack.c.bf16 %v540_v48, %v540_v48  ;;  %v2870_v48 = vld [vmem:[#allocation2 + $0x464] sm:$0xf0] }
 0x138   :  { %v536_v51 = vpop.f32.mrf.mxu3  ;;  %v525_v53 = vpop.f32.mrf.mxu2 }
 0x139   :  { %v537_v52 = vadd.f32 %v536_v51, %v524_v49  ;;  %752 = vmatmul.bf16.vlgmr.msra.gmra.mxu0 %v542_v50  ;;  %778 = vmatmul.bf16.vlgmr.msra.gmra.mxu2 %v542_v50  ;;  %v2406_v49 = vor.u32 %v2871_v44, %v2403_v46  ;;  %v2869_v50 = vld [vmem:[#allocation2 + $0x464] sm:$0xf]  ;;  %v2395_v51 = vld [vmem:[#allocation2 + $0x468] sm:$0xf0]  ;;  %v2394_v53 = vor.u32 %v2870_v48, %v2393_v47  ;;  %v2882_v46 = vld [vmem:[#allocation2 + $0x4c4] sm:$0xf0] }
 0x13a   :  { %v512_v54 = vpop.f32.mrf.mxu1  ;;  %1256 = vmatpush.bf16.msra.mxu0 %v2402_v45  ;;  %v2441_v45 = vld [vmem:[#allocation2 + $0x4c0] sm:$0xf]  ;;  %v2881_v47 = vld [vmem:[#allocation2 + $0x4c4] sm:$0xf] }
 0x13b   :  { %v541_v55 = vmax.f32 %v537_v52, 0.0  ;;  %v2465_v52 = vld [vmem:[#allocation2 + $0x4f0] sm:$0xf]  ;;  %v2888_v54 = vld [vmem:[#allocation2 + $0x4f4] sm:$0xf0]  ;;  %1282 = vmatpush.bf16.msra.mxu2 %v2406_v49  ;;  %v2442_v48 = vor.u32 %v2882_v46, %v2441_v45 }
 0x13c   :  { %v2466_v58 = vor.u32 %v2888_v54, %v2465_v52  ;;  %v2443_v49 = vld [vmem:[#allocation2 + $0x4c8] sm:$0xf0]  ;;  %v2862_v52 = vld [vmem:[#allocation2 + $0x424] sm:$0xf0] }
 0x13d   :  { %v543_v56 = vpack.c.bf16 %v541_v55, %v541_v55  ;;  %v2887_v55 = vld [vmem:[#allocation2 + $0x4f4] sm:$0xf] }
 0x13e   :  { %1257 = vmatpush.bf16.msra.mxu0 %v2394_v53  ;;  %v2861_v53 = vld [vmem:[#allocation2 + $0x424] sm:$0xf] }
 0x13f   :  { %765 = vmatmul.bf16.vlgmr.msra.gmra.mxu1 %v543_v56  ;;  %791 = vmatmul.bf16.vlgmr.msra.gmra.mxu3 %v543_v56  ;;  %v2467_v56 = vld [vmem:[#allocation2 + $0x4f8] sm:$0xf0] }
 0x140   :  { %v538_v57 = vpop.f32.mrf.mxu3  ;;  %v2470_v59 = vor.u32 %v2887_v55, %v2467_v56  ;;  %1269 = vmatpush.bf16.msra.mxu1 %v2466_v58  ;;  %v2363_v55 = vld [vmem:[#allocation2 + $0x428] sm:$0xf0]  ;;  %v2433_v56 = vld [vmem:[#allocation2 + $0x4b0] sm:$0xf] }
 0x141   :  { %v2398_v57 = vor.u32 %v2869_v50, %v2395_v51  ;;  %v2446_v50 = vor.u32 %v2881_v47, %v2443_v49  ;;  %v2361_v51 = vld [vmem:[#allocation2 + $0x420] sm:$0xf]  ;;  %v2366_v58 = vor.u32 %v2861_v53, %v2363_v55  ;;  %v2514_v47 = vld [vmem:[#allocation2 + $0x550] sm:$0xf]  ;;  %v2899_v49 = vld [vmem:[#allocation2 + $0x554] sm:$0xf] }
 0x142   :  { %1295 = vmatpush.bf16.msra.mxu3 %v2470_v59  ;;  %1258 = vmatpush.bf16.msra.mxu0 %v2386_v5  ;;  %v2362_v54 = vor.u32 %v2862_v52, %v2361_v51  ;;  %v2425_v5 = vld [vmem:[#allocation2 + $0x4a0] sm:$0xf]  ;;  %v2918_v52 = vld [vmem:[#allocation2 + $0x5e4] sm:$0xf0]  ;;  %v2588_v55 = vld [vmem:[#allocation2 + $0x5e8] sm:$0xf0] }
 0x143   :  { %1283 = vmatpush.bf16.msra.mxu2 %v2398_v57  ;;  %v2880_v57 = vld [vmem:[#allocation2 + $0x4b4] sm:$0xf0]  ;;  %v2586_v51 = vld [vmem:[#allocation2 + $0x5e0] sm:$0xf] }
 0x144   :  { %1270 = vmatpush.bf16.msra.mxu1 %v2458_v2  ;;  %v2434_v59 = vor.u32 %v2880_v57, %v2433_v56  ;;  %v2354_v2 = vor.u32 %v2860_v0, %v2353_v63  ;;  %v2587_v53 = vor.u32 %v2918_v52, %v2586_v51  ;;  %v2915_v63 = vld [vmem:[#allocation2 + $0x5d4] sm:$0xf]  ;;  %v2897_v0 = vld [vmem:[#allocation2 + $0x544] sm:$0xf]  ;;  %v2892_v51 = vld [vmem:[#allocation2 + $0x514] sm:$0xf0] }
 0x145   :  { %v2891_v52 = vld [vmem:[#allocation2 + $0x514] sm:$0xf] }
 0x146   :  { %1296 = vmatpush.bf16.msra.mxu3 %v2462_v6  ;;  %1259 = vmatpush.bf16.msra.mxu0 %v2378_v19  ;;  %v2878_v6 = vld [vmem:[#allocation2 + $0x4a4] sm:$0xf0]  ;;  %v2875_v19 = vld [vmem:[#allocation2 + $0x494] sm:$0xf] }
 0x147   :  { %1284 = vmatpush.bf16.msra.mxu2 %v2390_v9  ;;  %v2426_v7 = vor.u32 %v2878_v6, %v2425_v5  ;;  %v2427_v9 = vld [vmem:[#allocation2 + $0x4a8] sm:$0xf0] }
 0x148   :  { %1271 = vmatpush.bf16.msra.mxu1 %v2450_v17  ;;  %v2430_v10 = vor.u32 %v2877_v8, %v2427_v9  ;;  %v2417_v17 = vld [vmem:[#allocation2 + $0x490] sm:$0xf]  ;;  %v2511_v8 = vor.u32 %v2897_v0, %v2508_v1  ;;  %v2889_v0 = vld [vmem:[#allocation2 + $0x504] sm:$0xf] }
 0x149   :  { %v2498_v9 = vld [vmem:[#allocation2 + $0x530] sm:$0xf] }
 0x14a   :  { %1297 = vmatpush.bf16.msra.mxu3 %v2454_v18  ;;  %1260 = vmatpush.bf16.msra.mxu0 %v2370_v27  ;;  %v2876_v18 = vld [vmem:[#allocation2 + $0x494] sm:$0xf0]  ;;  %v2411_v27 = vld [vmem:[#allocation2 + $0x488] sm:$0xf0] }
 0x14b   :  { %1285 = vmatpush.bf16.msra.mxu2 %v2382_v21  ;;  %v2419_v21 = vld [vmem:[#allocation2 + $0x498] sm:$0xf0] }
 0x14c   :  { %1272 = vmatpush.bf16.msra.mxu1 %v2442_v48  ;;  %v2422_v22 = vor.u32 %v2875_v19, %v2419_v21  ;;  %v2900_v48 = vld [vmem:[#allocation2 + $0x554] sm:$0xf0] }
 0x14d   :  { %v2515_v56 = vor.u32 %v2900_v48, %v2514_v47  ;;  %v2911_v47 = vld [vmem:[#allocation2 + $0x5b4] sm:$0xf]  ;;  %v2564_v48 = vld [vmem:[#allocation2 + $0x5b8] sm:$0xf0] }
 0x14e   :  { %1298 = vmatpush.bf16.msra.mxu3 %v2446_v50  ;;  %1261 = vmatpush.bf16.msra.mxu0 %v2362_v54  ;;  %v2516_v50 = vld [vmem:[#allocation2 + $0x558] sm:$0xf0]  ;;  %v2917_v54 = vld [vmem:[#allocation2 + $0x5e4] sm:$0xf] }
 0x14f   :  { %1286 = vmatpush.bf16.msra.mxu2 %v2374_v28  ;;  %v2414_v28 = vor.u32 %v2873_v25, %v2411_v27  ;;  %v2591_v57 = vor.u32 %v2917_v54, %v2588_v55  ;;  %v2519_v60 = vor.u32 %v2899_v49, %v2516_v50  ;;  %v2567_v49 = vor.u32 %v2911_v47, %v2564_v48  ;;  %v2482_v50 = vld [vmem:[#allocation2 + $0x510] sm:$0xf]  ;;  %v2484_v54 = vld [vmem:[#allocation2 + $0x518] sm:$0xf0] }
 0x150   :  { %1273 = vmatpush.bf16.msra.mxu1 %v2434_v59  ;;  %v2898_v59 = vld [vmem:[#allocation2 + $0x544] sm:$0xf0]  ;;  %v2487_v55 = vor.u32 %v2891_v52, %v2484_v54  ;;  %v2707_v48 = vld [vmem:[#allocation2 + $0x6d0] sm:$0xf]  ;;  %v2637_v52 = vld [vmem:[#allocation2 + $0x648] sm:$0xf0] }
 0x151   :  { %v2342_v54 = vld [vmem:[%s3043_s2 + $0x8] sm:$0x3] }
 0x152   :  { %1299 = vmatpush.bf16.msra.mxu3 %v2438_v62  ;;  %1262 = vmatpush.bf16.msra.mxu0 %v2354_v2  ;;  %v2916_v62 = vld [vmem:[#allocation2 + $0x5d4] sm:$0xf0]  ;;  %v2580_v2 = vld [vmem:[#allocation2 + $0x5d8] sm:$0xf0] }
 0x153   :  { %1287 = vmatpush.bf16.msra.mxu2 %v2366_v58  ;;  %v2506_v58 = vld [vmem:[#allocation2 + $0x540] sm:$0xf]  ;;  %v2583_v5 = vor.u32 %v2915_v63, %v2580_v2  ;;  %v2890_v63 = vld [vmem:[#allocation2 + $0x504] sm:$0xf0]  ;;  %v2476_v2 = vld [vmem:[#allocation2 + $0x508] sm:$0xf0] }
 0x154   :  { %1274 = vmatpush.bf16.msra.mxu1 %v2426_v7  ;;  %v2507_v6 = vor.u32 %v2898_v59, %v2506_v58  ;;  %v2909_v59 = vld [vmem:[#allocation2 + $0x5a4] sm:$0xf] }
 0x156   :  { %1300 = vmatpush.bf16.msra.mxu3 %v2430_v10  ;;  %1263 = vmatpush.bf16.msra.mxu0 %v2346_v14  ;;  %v2896_v10 = vld [vmem:[#allocation2 + $0x534] sm:$0xf0] }
 0x157   :  { %1288 = vmatpush.bf16.msra.mxu2 %v2358_v4  ;;  %v2579_v4 = vor.u32 %v2916_v62, %v2578_v61  ;;  %v2499_v14 = vor.u32 %v2896_v10, %v2498_v9  ;;  %v2474_v62 = vld [vmem:[#allocation2 + $0x500] sm:$0xf] }
 0x158   :  { %v2475_v1 = vor.u32 %v2890_v63, %v2474_v62  ;;  %v2538_v10 = vld [vmem:[#allocation2 + $0x580] sm:$0xf]  ;;  %v1092_v62 = vperm.slane %v2342_v54, 0  ;;  %v2927_v63 = vld [vmem:[#allocation2 + $0x634] sm:$0xf] }
 0x15a   :  { %1301 = vmatpush.bf16.msra.mxu3 %v2422_v22 }
 0x15b   :  { %1289 = vmatpush.bf16.msra.mxu2 %v2350_v16 }
 0x15e   :  { %1302 = vmatpush.bf16.msra.mxu3 %v2414_v28 }
 0x1b6   :  { %v753_v20 = vpop.f32.mrf.mxu0 }
 0x1b7   :  { %v754_v29 = vadd.f32 %v753_v20, %v580_v24  ;;  %v2418_v20 = vor.u32 %v2876_v18, %v2417_v17  ;;  %v2874_v24 = vld [vmem:[#allocation2 + $0x484] sm:$0xf0] }
 0x1b8   :  { %v2410_v26 = vor.u32 %v2874_v24, %v2409_v23 }
 0x1b9   :  { %1275 = vmatpush.bf16.msra.mxu1 %v2418_v20  ;;  %v837_v20 = vperm.slane %v2213_v3, 1  ;;  %v2479_v3 = vor.u32 %v2889_v0, %v2476_v2  ;;  %v2629_v0 = vld [vmem:[#allocation2 + $0x638] sm:$0xf0] }
 0x1ba   :  { %v2632_v2 = vor.u32 %v2927_v63, %v2629_v0  ;;  %v2937_v63 = vld [vmem:[#allocation2 + $0x684] sm:$0xf] }
 0x1bc   :  { %v766_v30 = vpop.f32.mrf.mxu1  ;;  %v779_v31 = vpop.f32.mrf.mxu2 }
 0x1bd   :  { %v767_v32 = vadd.f32 %v766_v30, %v754_v29  ;;  %v780_v37 = vadd.f32 %v779_v31, %v581_v33  ;;  %1276 = vmatpush.bf16.msra.mxu1 %v2410_v26  ;;  %v2530_v29 = vld [vmem:[#allocation2 + $0x570] sm:$0xf]  ;;  %v2904_v30 = vld [vmem:[#allocation2 + $0x574] sm:$0xf0]  ;;  %v2903_v31 = vld [vmem:[#allocation2 + $0x574] sm:$0xf] }
 0x1be   :  { %v755_v34 = vpop.f32.mrf.mxu0  ;;  %v2532_v33 = vld [vmem:[#allocation2 + $0x578] sm:$0xf0] }
 0x1bf   :  { %v796_v35 = vmax.f32 %v767_v32, 0.0  ;;  %v2531_v32 = vor.u32 %v2904_v30, %v2530_v29  ;;  %v2522_v34 = vld [vmem:[#allocation2 + $0x560] sm:$0xf] }
 0x1c1   :  { %v798_v36 = vpack.c.bf16 %v796_v35, %v796_v35  ;;  %v2902_v35 = vld [vmem:[#allocation2 + $0x564] sm:$0xf0] }
 0x1c2   :  { %v792_v38 = vpop.f32.mrf.mxu3 }
 0x1c3   :  { %v793_v39 = vadd.f32 %v792_v38, %v780_v37  ;;  %1008 = vmatmul.bf16.vlgmr.msrb.gmra.mxu0 %v798_v36  ;;  %1034 = vmatmul.bf16.vlgmr.msrb.gmra.mxu2 %v798_v36  ;;  %v2535_v36 = vor.u32 %v2903_v31, %v2532_v33  ;;  %v2901_v37 = vld [vmem:[#allocation2 + $0x564] sm:$0xf]  ;;  %v2524_v38 = vld [vmem:[#allocation2 + $0x568] sm:$0xf0]  ;;  %v2914_v33 = vld [vmem:[#allocation2 + $0x5c4] sm:$0xf0] }
 0x1c4   :  { %v768_v40 = vpop.f32.mrf.mxu1  ;;  %v781_v41 = vpop.f32.mrf.mxu2  ;;  %1512 = vmatpush.bf16.msrb.mxu0 %v2531_v32  ;;  %v2570_v32 = vld [vmem:[#allocation2 + $0x5c0] sm:$0xf] }
 0x1c5   :  { %v797_v42 = vmax.f32 %v793_v39, 0.0  ;;  %v2594_v39 = vld [vmem:[#allocation2 + $0x5f0] sm:$0xf]  ;;  %v2523_v40 = vor.u32 %v2902_v35, %v2522_v34  ;;  %v2920_v41 = vld [vmem:[#allocation2 + $0x5f4] sm:$0xf0]  ;;  %1538 = vmatpush.bf16.msrb.mxu2 %v2535_v36  ;;  %v2571_v35 = vor.u32 %v2914_v33, %v2570_v32 }
 0x1c6   :  { %v2595_v45 = vor.u32 %v2920_v41, %v2594_v39  ;;  %v2913_v34 = vld [vmem:[#allocation2 + $0x5c4] sm:$0xf]  ;;  %v2572_v36 = vld [vmem:[#allocation2 + $0x5c8] sm:$0xf0]  ;;  %v2894_v39 = vld [vmem:[#allocation2 + $0x524] sm:$0xf0] }
 0x1c7   :  { %v799_v43 = vpack.c.bf16 %v797_v42, %v797_v42  ;;  %v2919_v42 = vld [vmem:[#allocation2 + $0x5f4] sm:$0xf] }
 0x1c8   :  { %1513 = vmatpush.bf16.msrb.mxu0 %v2523_v40  ;;  %v2893_v40 = vld [vmem:[#allocation2 + $0x524] sm:$0xf] }
 0x1c9   :  { %1021 = vmatmul.bf16.vlgmr.msrb.gmra.mxu1 %v799_v43  ;;  %1047 = vmatmul.bf16.vlgmr.msrb.gmra.mxu3 %v799_v43  ;;  %v2596_v43 = vld [vmem:[#allocation2 + $0x5f8] sm:$0xf0] }
 0x1ca   :  { %v794_v44 = vpop.f32.mrf.mxu3  ;;  %v2599_v46 = vor.u32 %v2919_v42, %v2596_v43  ;;  %1525 = vmatpush.bf16.msrb.mxu1 %v2595_v45  ;;  %v2492_v42 = vld [vmem:[#allocation2 + $0x528] sm:$0xf0]  ;;  %v2562_v43 = vld [vmem:[#allocation2 + $0x5b0] sm:$0xf] }
 0x1cb   :  { %v2527_v44 = vor.u32 %v2901_v37, %v2524_v38  ;;  %v2575_v37 = vor.u32 %v2913_v34, %v2572_v36  ;;  %v2490_v38 = vld [vmem:[#allocation2 + $0x520] sm:$0xf]  ;;  %v2495_v45 = vor.u32 %v2893_v40, %v2492_v42  ;;  %v2643_v34 = vld [vmem:[#allocation2 + $0x650] sm:$0xf]  ;;  %v2931_v36 = vld [vmem:[#allocation2 + $0x654] sm:$0xf] }
 0x1cc   :  { %1551 = vmatpush.bf16.msrb.mxu3 %v2599_v46  ;;  %1514 = vmatpush.bf16.msrb.mxu0 %v2515_v56  ;;  %v2491_v41 = vor.u32 %v2894_v39, %v2490_v38  ;;  %v2554_v56 = vld [vmem:[#allocation2 + $0x5a0] sm:$0xf]  ;;  %v2950_v39 = vld [vmem:[#allocation2 + $0x6e4] sm:$0xf0]  ;;  %v2717_v42 = vld [vmem:[#allocation2 + $0x6e8] sm:$0xf0] }
 0x1cd   :  { %1539 = vmatpush.bf16.msrb.mxu2 %v2527_v44  ;;  %v2912_v44 = vld [vmem:[#allocation2 + $0x5b4] sm:$0xf0]  ;;  %v2715_v38 = vld [vmem:[#allocation2 + $0x6e0] sm:$0xf] }
 0x1ce   :  { %1526 = vmatpush.bf16.msrb.mxu1 %v2587_v53  ;;  %v2563_v46 = vor.u32 %v2912_v44, %v2562_v43  ;;  %v2483_v53 = vor.u32 %v2892_v51, %v2482_v50  ;;  %v2716_v40 = vor.u32 %v2950_v39, %v2715_v38  ;;  %v2947_v50 = vld [vmem:[#allocation2 + $0x6d4] sm:$0xf]  ;;  %v2929_v51 = vld [vmem:[#allocation2 + $0x644] sm:$0xf]  ;;  %v2924_v38 = vld [vmem:[#allocation2 + $0x614] sm:$0xf0] }
 0x1cf   :  { %v2923_v39 = vld [vmem:[#allocation2 + $0x614] sm:$0xf] }
 0x1d0   :  { %1552 = vmatpush.bf16.msrb.mxu3 %v2591_v57  ;;  %1515 = vmatpush.bf16.msrb.mxu0 %v2507_v6  ;;  %v2910_v57 = vld [vmem:[#allocation2 + $0x5a4] sm:$0xf0]  ;;  %v2907_v6 = vld [vmem:[#allocation2 + $0x594] sm:$0xf] }
 0x1d1   :  { %1540 = vmatpush.bf16.msrb.mxu2 %v2519_v60  ;;  %v2555_v58 = vor.u32 %v2910_v57, %v2554_v56  ;;  %v2556_v60 = vld [vmem:[#allocation2 + $0x5a8] sm:$0xf0] }
 0x1d2   :  { %1527 = vmatpush.bf16.msrb.mxu1 %v2579_v4  ;;  %v2559_v61 = vor.u32 %v2909_v59, %v2556_v60  ;;  %v2546_v4 = vld [vmem:[#allocation2 + $0x590] sm:$0xf]  ;;  %v2640_v59 = vor.u32 %v2929_v51, %v2637_v52  ;;  %v2921_v51 = vld [vmem:[#allocation2 + $0x604] sm:$0xf] }
 0x1d3   :  { %v2627_v60 = vld [vmem:[#allocation2 + $0x630] sm:$0xf] }
 0x1d4   :  { %1553 = vmatpush.bf16.msrb.mxu3 %v2583_v5  ;;  %1516 = vmatpush.bf16.msrb.mxu0 %v2499_v14  ;;  %v2908_v5 = vld [vmem:[#allocation2 + $0x594] sm:$0xf0]  ;;  %v2540_v14 = vld [vmem:[#allocation2 + $0x588] sm:$0xf0] }
 0x1d5   :  { %1541 = vmatpush.bf16.msrb.mxu2 %v2511_v8  ;;  %v2548_v8 = vld [vmem:[#allocation2 + $0x598] sm:$0xf0] }
 0x1d6   :  { %1528 = vmatpush.bf16.msrb.mxu1 %v2571_v35  ;;  %v2551_v9 = vor.u32 %v2907_v6, %v2548_v8  ;;  %v2932_v35 = vld [vmem:[#allocation2 + $0x654] sm:$0xf0] }
 0x1d7   :  { %v2644_v43 = vor.u32 %v2932_v35, %v2643_v34  ;;  %v2943_v34 = vld [vmem:[#allocation2 + $0x6b4] sm:$0xf]  ;;  %v2693_v35 = vld [vmem:[#allocation2 + $0x6b8] sm:$0xf0] }
 0x1d8   :  { %1554 = vmatpush.bf16.msrb.mxu3 %v2575_v37  ;;  %1517 = vmatpush.bf16.msrb.mxu0 %v2491_v41  ;;  %v2645_v37 = vld [vmem:[#allocation2 + $0x658] sm:$0xf0]  ;;  %v2949_v41 = vld [vmem:[#allocation2 + $0x6e4] sm:$0xf] }
 0x1d9   :  { %1542 = vmatpush.bf16.msrb.mxu2 %v2503_v15  ;;  %v2543_v15 = vor.u32 %v2905_v12, %v2540_v14  ;;  %v2720_v44 = vor.u32 %v2949_v41, %v2717_v42  ;;  %v2648_v47 = vor.u32 %v2931_v36, %v2645_v37  ;;  %v2696_v36 = vor.u32 %v2943_v34, %v2693_v35  ;;  %v2611_v37 = vld [vmem:[#allocation2 + $0x610] sm:$0xf]  ;;  %v2613_v41 = vld [vmem:[#allocation2 + $0x618] sm:$0xf0] }
 0x1da   :  { %1529 = vmatpush.bf16.msrb.mxu1 %v2563_v46  ;;  %v2930_v46 = vld [vmem:[#allocation2 + $0x644] sm:$0xf0]  ;;  %v2616_v42 = vor.u32 %v2923_v39, %v2613_v41 }
 0x1dc   :  { %1555 = vmatpush.bf16.msrb.mxu3 %v2567_v49  ;;  %1518 = vmatpush.bf16.msrb.mxu0 %v2483_v53  ;;  %v2948_v49 = vld [vmem:[#allocation2 + $0x6d4] sm:$0xf0]  ;;  %v2709_v53 = vld [vmem:[#allocation2 + $0x6d8] sm:$0xf0] }
 0x1dd   :  { %1543 = vmatpush.bf16.msrb.mxu2 %v2495_v45  ;;  %v2635_v45 = vld [vmem:[#allocation2 + $0x640] sm:$0xf]  ;;  %v2712_v56 = vor.u32 %v2947_v50, %v2709_v53  ;;  %v2922_v50 = vld [vmem:[#allocation2 + $0x604] sm:$0xf0]  ;;  %v2605_v53 = vld [vmem:[#allocation2 + $0x608] sm:$0xf0] }
 0x1de   :  { %1530 = vmatpush.bf16.msrb.mxu1 %v2555_v58  ;;  %v2636_v57 = vor.u32 %v2930_v46, %v2635_v45  ;;  %v2941_v46 = vld [vmem:[#allocation2 + $0x6a4] sm:$0xf] }
 0x1e0   :  { %1556 = vmatpush.bf16.msrb.mxu3 %v2559_v61  ;;  %1519 = vmatpush.bf16.msrb.mxu0 %v2475_v1  ;;  %v2928_v61 = vld [vmem:[#allocation2 + $0x634] sm:$0xf0] }
 0x1e1   :  { %1544 = vmatpush.bf16.msrb.mxu2 %v2487_v55  ;;  %v2708_v55 = vor.u32 %v2948_v49, %v2707_v48  ;;  %v2628_v1 = vor.u32 %v2928_v61, %v2627_v60  ;;  %v2603_v49 = vld [vmem:[#allocation2 + $0x600] sm:$0xf] }
 0x1e2   :  { %v2604_v52 = vor.u32 %v2922_v50, %v2603_v49  ;;  %v2667_v61 = vld [vmem:[#allocation2 + $0x680] sm:$0xf] }
 0x1e4   :  { %1557 = vmatpush.bf16.msrb.mxu3 %v2551_v9 }
 0x1e5   :  { %1545 = vmatpush.bf16.msrb.mxu2 %v2479_v3 }
 0x1e8   :  { %1558 = vmatpush.bf16.msrb.mxu3 %v2543_v15 }
 0x240   :  { %v1009_v7 = vpop.f32.mrf.mxu0 }
 0x241   :  { %v1010_v16 = vadd.f32 %v1009_v7, %v836_v11  ;;  %v2547_v7 = vor.u32 %v2908_v5, %v2546_v4  ;;  %v2906_v11 = vld [vmem:[#allocation2 + $0x584] sm:$0xf0] }
 0x242   :  { %v2539_v13 = vor.u32 %v2906_v11, %v2538_v10 }
 0x243   :  { %1531 = vmatpush.bf16.msrb.mxu1 %v2547_v7  ;;  %v1093_v7 = vperm.slane %v2342_v54, 1  ;;  %v2608_v54 = vor.u32 %v2921_v51, %v2605_v53 }
 0x246   :  { %v1022_v17 = vpop.f32.mrf.mxu1  ;;  %v1035_v18 = vpop.f32.mrf.mxu2 }
 0x247   :  { %v1023_v19 = vadd.f32 %v1022_v17, %v1010_v16  ;;  %v1036_v24 = vadd.f32 %v1035_v18, %v837_v20  ;;  %1532 = vmatpush.bf16.msrb.mxu1 %v2539_v13  ;;  %v2659_v16 = vld [vmem:[#allocation2 + $0x670] sm:$0xf]  ;;  %v2936_v17 = vld [vmem:[#allocation2 + $0x674] sm:$0xf0]  ;;  %v2935_v18 = vld [vmem:[#allocation2 + $0x674] sm:$0xf] }
 0x248   :  { %v1011_v21 = vpop.f32.mrf.mxu0  ;;  %v2661_v20 = vld [vmem:[#allocation2 + $0x678] sm:$0xf0] }
 0x249   :  { %v1052_v22 = vmax.f32 %v1023_v19, 0.0  ;;  %v2660_v19 = vor.u32 %v2936_v17, %v2659_v16  ;;  %v2651_v21 = vld [vmem:[#allocation2 + $0x660] sm:$0xf] }
 0x24b   :  { %v1054_v23 = vpack.c.bf16 %v1052_v22, %v1052_v22  ;;  %v2934_v22 = vld [vmem:[#allocation2 + $0x664] sm:$0xf0] }
 0x24c   :  { %v1048_v25 = vpop.f32.mrf.mxu3 }
 0x24d   :  { %v1049_v26 = vadd.f32 %v1048_v25, %v1036_v24  ;;  %1264 = vmatmul.bf16.vlgmr.msra.gmra.mxu0 %v1054_v23  ;;  %1290 = vmatmul.bf16.vlgmr.msra.gmra.mxu2 %v1054_v23  ;;  %v2664_v23 = vor.u32 %v2935_v18, %v2661_v20  ;;  %v2933_v24 = vld [vmem:[#allocation2 + $0x664] sm:$0xf]  ;;  %v2653_v25 = vld [vmem:[#allocation2 + $0x668] sm:$0xf0]  ;;  %v2946_v20 = vld [vmem:[#allocation2 + $0x6c4] sm:$0xf0] }
 0x24e   :  { %v1024_v27 = vpop.f32.mrf.mxu1  ;;  %v1037_v28 = vpop.f32.mrf.mxu2  ;;  %1768 = vmatpush.bf16.msra.mxu0 %v2660_v19  ;;  %v2699_v19 = vld [vmem:[#allocation2 + $0x6c0] sm:$0xf] }
 0x24f   :  { %v1053_v29 = vmax.f32 %v1049_v26, 0.0  ;;  %v2723_v26 = vld [vmem:[#allocation2 + $0x6f0] sm:$0xf]  ;;  %v2652_v27 = vor.u32 %v2934_v22, %v2651_v21  ;;  %v2952_v28 = vld [vmem:[#allocation2 + $0x6f4] sm:$0xf0]  ;;  %1794 = vmatpush.bf16.msra.mxu2 %v2664_v23  ;;  %v2700_v22 = vor.u32 %v2946_v20, %v2699_v19 }
 0x250   :  { %v2724_v32 = vor.u32 %v2952_v28, %v2723_v26  ;;  %v2945_v21 = vld [vmem:[#allocation2 + $0x6c4] sm:$0xf]  ;;  %v2701_v23 = vld [vmem:[#allocation2 + $0x6c8] sm:$0xf0]  ;;  %v2926_v26 = vld [vmem:[#allocation2 + $0x624] sm:$0xf0] }
 0x251   :  { %v1055_v30 = vpack.c.bf16 %v1053_v29, %v1053_v29  ;;  %v2951_v29 = vld [vmem:[#allocation2 + $0x6f4] sm:$0xf] }
 0x252   :  { %1769 = vmatpush.bf16.msra.mxu0 %v2652_v27  ;;  %v2925_v27 = vld [vmem:[#allocation2 + $0x624] sm:$0xf] }
 0x253   :  { %1277 = vmatmul.bf16.vlgmr.msra.gmra.mxu1 %v1055_v30  ;;  %1303 = vmatmul.bf16.vlgmr.msra.gmra.mxu3 %v1055_v30  ;;  %v2725_v30 = vld [vmem:[#allocation2 + $0x6f8] sm:$0xf0] }
 0x254   :  { %v1050_v31 = vpop.f32.mrf.mxu3  ;;  %v2728_v33 = vor.u32 %v2951_v29, %v2725_v30  ;;  %1781 = vmatpush.bf16.msra.mxu1 %v2724_v32  ;;  %v2621_v29 = vld [vmem:[#allocation2 + $0x628] sm:$0xf0]  ;;  %v2691_v30 = vld [vmem:[#allocation2 + $0x6b0] sm:$0xf] }
 0x255   :  { %v2656_v31 = vor.u32 %v2933_v24, %v2653_v25  ;;  %v2704_v24 = vor.u32 %v2945_v21, %v2701_v23  ;;  %v2619_v25 = vld [vmem:[#allocation2 + $0x620] sm:$0xf]  ;;  %v2624_v32 = vor.u32 %v2925_v27, %v2621_v29 }
 0x256   :  { %1807 = vmatpush.bf16.msra.mxu3 %v2728_v33  ;;  %1770 = vmatpush.bf16.msra.mxu0 %v2644_v43  ;;  %v2620_v28 = vor.u32 %v2926_v26, %v2619_v25  ;;  %v2683_v43 = vld [vmem:[#allocation2 + $0x6a0] sm:$0xf] }
 0x257   :  { %1795 = vmatpush.bf16.msra.mxu2 %v2656_v31  ;;  %v2944_v31 = vld [vmem:[#allocation2 + $0x6b4] sm:$0xf0] }
 0x258   :  { %1782 = vmatpush.bf16.msra.mxu1 %v2716_v40  ;;  %v2692_v33 = vor.u32 %v2944_v31, %v2691_v30  ;;  %v2612_v40 = vor.u32 %v2924_v38, %v2611_v37 }
 0x25a   :  { %1808 = vmatpush.bf16.msra.mxu3 %v2720_v44  ;;  %1771 = vmatpush.bf16.msra.mxu0 %v2636_v57  ;;  %v2942_v44 = vld [vmem:[#allocation2 + $0x6a4] sm:$0xf0]  ;;  %v2939_v57 = vld [vmem:[#allocation2 + $0x694] sm:$0xf] }
 0x25b   :  { %1796 = vmatpush.bf16.msra.mxu2 %v2648_v47  ;;  %v2684_v45 = vor.u32 %v2942_v44, %v2683_v43  ;;  %v2685_v47 = vld [vmem:[#allocation2 + $0x6a8] sm:$0xf0] }
 0x25c   :  { %1783 = vmatpush.bf16.msra.mxu1 %v2708_v55  ;;  %v2688_v48 = vor.u32 %v2941_v46, %v2685_v47  ;;  %v2675_v55 = vld [vmem:[#allocation2 + $0x690] sm:$0xf] }
 0x25e   :  { %1809 = vmatpush.bf16.msra.mxu3 %v2712_v56  ;;  %1772 = vmatpush.bf16.msra.mxu0 %v2628_v1  ;;  %v2940_v56 = vld [vmem:[#allocation2 + $0x694] sm:$0xf0]  ;;  %v2669_v1 = vld [vmem:[#allocation2 + $0x688] sm:$0xf0] }
 0x25f   :  { %1797 = vmatpush.bf16.msra.mxu2 %v2640_v59  ;;  %v2677_v59 = vld [vmem:[#allocation2 + $0x698] sm:$0xf0] }
 0x260   :  { %1784 = vmatpush.bf16.msra.mxu1 %v2700_v22  ;;  %v2680_v60 = vor.u32 %v2939_v57, %v2677_v59  ;;  %v2600_v22 = vld [vmem:[%s3043_s2 + $0xc] sm:$0x3] }
 0x261   :  { %v1605_v29 = vperm.slane %v2600_v22, 1 }
 0x262   :  { %1810 = vmatpush.bf16.msra.mxu3 %v2704_v24  ;;  %1773 = vmatpush.bf16.msra.mxu0 %v2620_v28  ;;  %v1604_v24 = vperm.slane %v2600_v22, 0 }
 0x263   :  { %1798 = vmatpush.bf16.msra.mxu2 %v2632_v2  ;;  %v2672_v2 = vor.u32 %v2937_v63, %v2669_v1 }
 0x264   :  { %1785 = vmatpush.bf16.msra.mxu1 %v2692_v33 }
 0x266   :  { %1811 = vmatpush.bf16.msra.mxu3 %v2696_v36  ;;  %1774 = vmatpush.bf16.msra.mxu0 %v2612_v40 }
 0x267   :  { %1799 = vmatpush.bf16.msra.mxu2 %v2624_v32 }
 0x268   :  { %1786 = vmatpush.bf16.msra.mxu1 %v2684_v45 }
 0x26a   :  { %1812 = vmatpush.bf16.msra.mxu3 %v2688_v48  ;;  %1775 = vmatpush.bf16.msra.mxu0 %v2604_v52 }
 0x26b   :  { %1800 = vmatpush.bf16.msra.mxu2 %v2616_v42 }
 0x26e   :  { %1813 = vmatpush.bf16.msra.mxu3 %v2680_v60 }
 0x26f   :  { %1801 = vmatpush.bf16.msra.mxu2 %v2608_v54 }
 0x272   :  { %1814 = vmatpush.bf16.msra.mxu3 %v2672_v2 }
 0x2ca   :  { %v1265_v58 = vpop.f32.mrf.mxu0 }
 0x2cb   :  { %v1266_v3 = vadd.f32 %v1265_v58, %v1092_v62  ;;  %v2676_v58 = vor.u32 %v2940_v56, %v2675_v55  ;;  %v2938_v62 = vld [vmem:[#allocation2 + $0x684] sm:$0xf0] }
 0x2cc   :  { %v2668_v0 = vor.u32 %v2938_v62, %v2667_v61 }
 0x2cd   :  { %1787 = vmatpush.bf16.msra.mxu1 %v2676_v58 }
 0x2d0   :  { %v1278_v4 = vpop.f32.mrf.mxu1  ;;  %v1291_v5 = vpop.f32.mrf.mxu2 }
 0x2d1   :  { %v1279_v6 = vadd.f32 %v1278_v4, %v1266_v3  ;;  %v1292_v11 = vadd.f32 %v1291_v5, %v1093_v7  ;;  %1788 = vmatpush.bf16.msra.mxu1 %v2668_v0  ;;  %v2471_v3 = vld [vmem:[%s3043_s2 + $0xa] sm:$0x3] }
 0x2d2   :  { %v1267_v8 = vpop.f32.mrf.mxu0  ;;  %v1348_v5 = vperm.slane %v2471_v3, 0 }
 0x2d3   :  { %v1308_v9 = vmax.f32 %v1279_v6, 0.0 }
 0x2d5   :  { %v1310_v10 = vpack.c.bf16 %v1308_v9, %v1308_v9 }
 0x2d6   :  { %v1304_v12 = vpop.f32.mrf.mxu3 }
 0x2d7   :  { %v1305_v13 = vadd.f32 %v1304_v12, %v1292_v11  ;;  %1520 = vmatmul.bf16.vlgmr.msrb.gmra.mxu0 %v1310_v10  ;;  %1546 = vmatmul.bf16.vlgmr.msrb.gmra.mxu2 %v1310_v10  ;;  %v1349_v10 = vperm.slane %v2471_v3, 1 }
 0x2d8   :  { %v1280_v14 = vpop.f32.mrf.mxu1  ;;  %v1293_v15 = vpop.f32.mrf.mxu2 }
 0x2d9   :  { %v1309_v16 = vmax.f32 %v1305_v13, 0.0 }
 0x2db   :  { %v1311_v17 = vpack.c.bf16 %v1309_v16, %v1309_v16 }
 0x2dd   :  { %1533 = vmatmul.bf16.vlgmr.msrb.gmra.mxu1 %v1311_v17  ;;  %1559 = vmatmul.bf16.vlgmr.msrb.gmra.mxu3 %v1311_v17 }
 0x2de   :  { %v1306_v18 = vpop.f32.mrf.mxu3 }
 0x354   :  { %v1521_v4 = vpop.f32.mrf.mxu0 }
 0x355   :  { %v1522_v6 = vadd.f32 %v1521_v4, %v1348_v5 }
 0x35a   :  { %v1534_v7 = vpop.f32.mrf.mxu1  ;;  %v1547_v8 = vpop.f32.mrf.mxu2 }
 0x35b   :  { %v1535_v9 = vadd.f32 %v1534_v7, %v1522_v6  ;;  %v1548_v14 = vadd.f32 %v1547_v8, %v1349_v10 }
 0x35c   :  { %v1523_v11 = vpop.f32.mrf.mxu0 }
 0x35d   :  { %v1564_v12 = vmax.f32 %v1535_v9, 0.0 }
 0x35f   :  { %v1566_v13 = vpack.c.bf16 %v1564_v12, %v1564_v12 }
 0x360   :  { %v1560_v15 = vpop.f32.mrf.mxu3 }
 0x361   :  { %v1561_v16 = vadd.f32 %v1560_v15, %v1548_v14  ;;  %1776 = vmatmul.bf16.vlgmr.msra.gmra.mxu0 %v1566_v13  ;;  %1802 = vmatmul.bf16.vlgmr.msra.gmra.mxu2 %v1566_v13 }
 0x362   :  { %v1536_v17 = vpop.f32.mrf.mxu1  ;;  %v1549_v18 = vpop.f32.mrf.mxu2 }
 0x363   :  { %v1565_v19 = vmax.f32 %v1561_v16, 0.0 }
 0x365   :  { %v1567_v20 = vpack.c.bf16 %v1565_v19, %v1565_v19 }
 0x367   :  { %1789 = vmatmul.bf16.vlgmr.msra.gmra.mxu1 %v1567_v20  ;;  %1815 = vmatmul.bf16.vlgmr.msra.gmra.mxu3 %v1567_v20 }
 0x368   :  { %v1562_v21 = vpop.f32.mrf.mxu3 }
 0x3de   :  { %v1777_v23 = vpop.f32.mrf.mxu0 }
 0x3df   :  { %v1778_v25 = vadd.f32 %v1777_v23, %v1604_v24 }
 0x3e4   :  { %v1790_v26 = vpop.f32.mrf.mxu1  ;;  %v1803_v27 = vpop.f32.mrf.mxu2 }
 0x3e5   :  { %v1791_v28 = vadd.f32 %v1790_v26, %v1778_v25  ;;  %v1804_v31 = vadd.f32 %v1803_v27, %v1605_v29 }
 0x3e6   :  { %v1779_v30 = vpop.f32.mrf.mxu0 }
 0x3e7   :  { %1820 = vst [vmem:[%s3044_s3] sm:$0xff] %v1791_v28 }
 0x3ea   :  { %v1816_v32 = vpop.f32.mrf.mxu3 }
 0x3eb   :  { %v1817_v33 = vadd.f32 %v1816_v32, %v1804_v31 }
 0x3ec   :  { %v1792_v34 = vpop.f32.mrf.mxu1  ;;  %v1805_v35 = vpop.f32.mrf.mxu2 }
 0x3ed   :  { %1821 = vst [vmem:[%s3044_s3 + $0x8] sm:$0xff] %v1817_v33 }
 0x3f2   :  { %v1818_v36 = vpop.f32.mrf.mxu3 }
 0x3f3   :  { %1826 = vsyncpa [#allocation3], 1 }

</bundles_post_ra>
